<compile_context>
chip_gen: v7x
topology: tpu7x:2x2x1
jax: 0.10.0
libtpu: 0.0.40
codegen_flags: <defaults>
</compile_context>

<pallas_src>
import functools
import math

import jax
import jax.numpy as jnp
from jax.experimental import pallas as pl
from jax.experimental.pallas import tpu as pltpu

LN_EPS = 1e-5  # torch nn.LayerNorm default


def _round_up(x, m):
    return (x + m - 1) // m * m


def _vmem_limit_bytes():
    # 0.9 * physical: ~115 MiB on 128-MiB chips (v5e/v6e), ~57 MiB on v7x.
    try:
        cap = pltpu.get_tpu_info().vmem_capacity_bytes
    except Exception:
        cap = 64 * 1024 * 1024
    return int(cap * 0.9)


_VMEM_LIMIT = _vmem_limit_bytes()


def _gelu_exact(x):
    # torch activation='gelu' -> exact erf-based GELU
    return 0.5 * x * (1.0 + jax.lax.erf(x * (1.0 / math.sqrt(2.0))))


def _layernorm(x, gamma, beta):
    mu = jnp.mean(x, axis=-1, keepdims=True)
    var = jnp.mean(jnp.square(x - mu), axis=-1, keepdims=True)
    return (x - mu) * jax.lax.rsqrt(var + LN_EPS) * gamma + beta


def _bf16(x):
    return x.astype(jnp.bfloat16)


# ---------------------------------------------------------------------------
# Pallas kernels
# ---------------------------------------------------------------------------
def _patch_embed_kernel(x_ref, w_ref, o_ref):
    # (tm, patch_dim) bf16 @ (patch_dim, D) bf16 on the MXU, f32 accumulate.
    o_ref[...] = jnp.dot(x_ref[...], w_ref[...],
                         preferred_element_type=jnp.float32)


def _encoder_stack_kernel(nhead, n_chunks, rc,
                          x_ref, bias_ref, ln0_g, ln0_b,
                          ln1_g, ln1_b, wqkv, bqkv, wout, bout,
                          ln2_g, ln2_b, w1, b1, w2, b2,
                          o_ref, qkv_scr, attn_scr):
    # grid = (n_layers,): the (Rtot, D) output block is VMEM-resident across
    # the whole layer axis and carries the residual stream; each layer's
    # weights are streamed from HBM exactly once per forward.
    layer = pl.program_id(0)
    D = x_ref.shape[1]
    hd = D // nhead
    scale = 1.0 / math.sqrt(hd)

    # Fused initial LayerNorm at layer 0 (pos-embedding add is done in JAX).
    @pl.when(layer == 0)
    def _():
        o_ref[...] = _layernorm(x_ref[...], ln0_g[...], ln0_b[...])

    bias = bias_ref[...]          # (rc, rc) block-diag + padded-key mask

    for ci in range(n_chunks):    # static loop over batch-row chunks
        r0 = ci * rc
        x = o_ref[pl.ds(r0, rc), :]                       # (rc, D) residual

        # ---- self-attention: x = x + Wout @ MHA(LN1(x)) -------------------
        h = _layernorm(x, ln1_g[...], ln1_b[...])
        qkv_scr[...] = jnp.dot(_bf16(h), wqkv[...],
                               preferred_element_type=jnp.float32) + bqkv[...]

        def head_out(hi):
            c0 = hi * hd
            qh = qkv_scr[:, c0:c0 + hd]
            kh = qkv_scr[:, D + c0:D + c0 + hd]
            vh = qkv_scr[:, 2 * D + c0:2 * D + c0 + hd]
            s = jax.lax.dot_general(qh, kh, (((1,), (1,)), ((), ())),
                                    preferred_element_type=jnp.float32)
            s = s * scale + bias
            s = s - jnp.max(s, axis=-1, keepdims=True)
            p = jnp.exp(s)
            p = p * pl.reciprocal(jnp.sum(p, axis=-1, keepdims=True),
                                  approx=False)
            return jnp.dot(p, vh, preferred_element_type=jnp.float32)

        # process heads in pairs -> 2*hd-lane (128-lane for the real model)
        # aligned stores into the attention-output slab.
        for pi in range(nhead // 2):
            pair = jnp.concatenate([head_out(2 * pi), head_out(2 * pi + 1)],
                                   axis=1)
            attn_scr[:, 2 * pi * hd:(2 * pi + 2) * hd] = pair
        if nhead % 2:
            attn_scr[:, (nhead - 1) * hd:nhead * hd] = head_out(nhead - 1)

        attn = jnp.dot(_bf16(attn_scr[...]), wout[...],
                       preferred_element_type=jnp.float32) + bout[...]
        x = x + attn

        # ---- feed-forward: x = x + W2 @ gelu(W1 @ LN2(x)) ------------------
        h = _layernorm(x, ln2_g[...], ln2_b[...])
        h = jnp.dot(_bf16(h), w1[...],
                    preferred_element_type=jnp.float32) + b1[...]
        h = _gelu_exact(h)
        h = jnp.dot(_bf16(h), w2[...],
                    preferred_element_type=jnp.float32) + b2[...]
        o_ref[pl.ds(r0, rc), :] = x + h


def _mlp_head_kernel(x_ref, g_ref, b_ref, w1_ref, b1_ref, w2_ref, b2_ref, o_ref):
    h = _layernorm(x_ref[...], g_ref[...], b_ref[...])
    h = jnp.dot(_bf16(h), w1_ref[...],
                preferred_element_type=jnp.float32) + b1_ref[...]
    o_ref[...] = jnp.dot(_bf16(h), w2_ref[...],
                         preferred_element_type=jnp.float32) + b2_ref[...]


# ---------------------------------------------------------------------------
# Wrappers around pallas_call
# ---------------------------------------------------------------------------
def patch_embed(x_flat_bf16, w_pe, *, tm=512):
    M, K = x_flat_bf16.shape
    D = w_pe.shape[1]
    tm = min(tm, _round_up(M, 8))
    Mp = _round_up(M, tm)
    if Mp != M:
        x_flat_bf16 = jnp.pad(x_flat_bf16, ((0, Mp - M), (0, 0)))
    out = pl.pallas_call(
        _patch_embed_kernel,
        out_shape=jax.ShapeDtypeStruct((Mp, D), jnp.float32),
        grid=(Mp // tm,),
        in_specs=[pl.BlockSpec((tm, K), lambda i: (i, 0)),
                  pl.BlockSpec((K, D), lambda i: (0, 0))],   # weight resident
        out_specs=pl.BlockSpec((tm, D), lambda i: (i, 0)),
        compiler_params=pltpu.CompilerParams(
            dimension_semantics=("parallel",),
            vmem_limit_bytes=_VMEM_LIMIT),
    )(x_flat_bf16, w_pe)
    return out[:M]


_STACK_KEYS = ("ln1_g", "ln1_b", "wqkv", "bqkv", "wout", "bout",
               "ln2_g", "ln2_b", "w1", "b1", "w2", "b2")


def encoder_stack(x_slab, attn_bias, ln0_g, ln0_b, stack, *,
                  nhead, chunk_rows, n_layers):
    Rtot, D = x_slab.shape
    n_chunks = Rtot // chunk_rows
    weights = [stack[k] for k in _STACK_KEYS]

    in_specs = [
        pl.BlockSpec((Rtot, D), lambda l: (0, 0)),            # full act slab
        pl.BlockSpec(tuple(attn_bias.shape), lambda l: (0, 0)),
        pl.BlockSpec((1, D), lambda l: (0, 0)),               # LN0 gamma
        pl.BlockSpec((1, D), lambda l: (0, 0)),               # LN0 beta
    ]
    for w in weights:                                         # layer-indexed
        in_specs.append(
            pl.BlockSpec((None,) + tuple(w.shape[1:]),
                         lambda l: (l, 0, 0)))

    kern = functools.partial(_encoder_stack_kernel, nhead, n_chunks, chunk_rows)
    return pl.pallas_call(
        kern,
        out_shape=jax.ShapeDtypeStruct((Rtot, D), jnp.float32),
        grid=(n_layers,),
        in_specs=in_specs,
        out_specs=pl.BlockSpec((Rtot, D), lambda l: (0, 0)),  # resident carry
        scratch_shapes=[pltpu.VMEM((chunk_rows, 3 * D), jnp.float32),
                        pltpu.VMEM((chunk_rows, D), jnp.float32)],
        compiler_params=pltpu.CompilerParams(
            dimension_semantics=("arbitrary",),
            vmem_limit_bytes=_VMEM_LIMIT),
    )(x_slab, attn_bias, ln0_g, ln0_b, *weights)


def mlp_head(x, hp):
    N, _ = x.shape
    dim_out = hp["w2"].shape[1]
    do_pad = _round_up(dim_out, 128)                          # lane-dense out
    w2 = jnp.pad(hp["w2"], ((0, 0), (0, do_pad - dim_out)))
    b2 = jnp.pad(hp["b2"], ((0, 0), (0, do_pad - dim_out)))
    args = (x, hp["ln_g"], hp["ln_b"], hp["w1"], hp["b1"], w2, b2)
    out = pl.pallas_call(
        _mlp_head_kernel,
        out_shape=jax.ShapeDtypeStruct((N, do_pad), jnp.float32),
        in_specs=[pl.BlockSpec(memory_space=pltpu.MemorySpace.VMEM)] * len(args),
        out_specs=pl.BlockSpec(memory_space=pltpu.MemorySpace.VMEM),
        compiler_params=pltpu.CompilerParams(vmem_limit_bytes=_VMEM_LIMIT),
    )(*args)
    return out[:, :dim_out]


# ---------------------------------------------------------------------------
# Full forward (mirrors ViTBaseOver32at224.forward)
# ---------------------------------------------------------------------------
def vit_forward(x, params, cfg):
    N, c, H, W = x.shape
    p, D = cfg["p"], cfg["dim"]
    nhead, L = cfg["nhead"], cfg["n_layers"]
    nh, nw = H // p, W // p
    n_patches = nh * nw
    patch_dim = p * p * c
    S = n_patches + 1
    s_pad = _round_up(S, 8)                     # pad seq for clean sublanes
    bt = max(1, min(cfg.get("batch_tile", 8), N))
    n_pad = _round_up(N, bt)
    rc = bt * s_pad                             # rows per in-kernel chunk

    # Rearrange('b c (h p1) (w p2) -> b (h w) (p1 p2 c)')   [glue, bf16]
    xp = (x.reshape(N, c, nh, p, nw, p)
           .transpose(0, 2, 4, 3, 5, 1)
           .reshape(N * n_patches, patch_dim)).astype(jnp.bfloat16)
    y = patch_embed(xp, params["patch_embedding"])
    y = y.reshape(N, n_patches, D)

    # prepend class token, add pos-embedding (fused by XLA into the pack),
    # pad sequence & batch, pack into one (rows, D) slab.
    cls = jnp.broadcast_to(params["class_token"], (N, 1, D)).astype(jnp.float32)
    y = jnp.concatenate([cls, y], axis=1)                     # (N, S, D)
    y = y + params["pos_embedding"]
    y = jnp.pad(y, ((0, n_pad - N), (0, s_pad - S), (0, 0)))
    x_slab = y.reshape(n_pad * s_pad, D)

    # block-diagonal (per-image) attention bias; padded key columns masked.
    rows = jnp.arange(rc)
    img = rows // s_pad
    col_pos = rows % s_pad
    mask = (img[:, None] == img[None, :]) & (col_pos[None, :] < S)
    attn_bias = jnp.where(mask, 0.0, -1e30).astype(jnp.float32)

    # transformer encoder (norm_first, no final norm) + fused initial LN
    y = encoder_stack(x_slab, attn_bias, params["ln0_g"], params["ln0_b"],
                      params["layers"], nhead=nhead, chunk_rows=rc,
                      n_layers=L)

    # class-token readout + mlp head
    cls_tok = y.reshape(n_pad, s_pad, D)[:N, 0, :]
    return mlp_head(cls_tok, params["head"])


# ---------------------------------------------------------------------------
# Pure-JAX reference (same bf16-quantized weights, f32 math)
# ---------------------------------------------------------------------------
def vit_forward_ref(x, params, cfg):
    N, c, H, W = x.shape
    p, D, nhead, L = cfg["p"], cfg["dim"], cfg["nhead"], cfg["n_layers"]
    nh, nw = H // p, W // p
    hd = D // nhead
    f32 = lambda a: a.astype(jnp.float32)
    xp = (x.reshape(N, c, nh, p, nw, p)
           .transpose(0, 2, 4, 3, 5, 1)
           .reshape(N, nh * nw, p * p * c))
    y = jnp.einsum("nsk,kd->nsd", xp, f32(params["patch_embedding"]),
                   precision="highest")
    cls = jnp.broadcast_to(params["class_token"], (N, 1, D))
    y = jnp.concatenate([cls, y], axis=1)
    y = y + params["pos_embedding"]
    y = _layernorm(y, params["ln0_g"], params["ln0_b"])
    st = params["layers"]
    for l in range(L):
        h = _layernorm(y, st["ln1_g"][l], st["ln1_b"][l])
        qkv = jnp.einsum("nsd,de->nse", h, f32(st["wqkv"][l]),
                         precision="highest") + st["bqkv"][l]
        q, k, v = jnp.split(qkv, 3, axis=-1)
        q = q.reshape(N, -1, nhead, hd).transpose(0, 2, 1, 3)
        k = k.reshape(N, -1, nhead, hd).transpose(0, 2, 1, 3)
        v = v.reshape(N, -1, nhead, hd).transpose(0, 2, 1, 3)
        s = jnp.einsum("nhqd,nhkd->nhqk", q, k,
                       precision="highest") / math.sqrt(hd)
        a = jax.nn.softmax(s, axis=-1)
        o = jnp.einsum("nhqk,nhkd->nhqd", a, v, precision="highest")
        o = o.transpose(0, 2, 1, 3).reshape(N, -1, D)
        o = jnp.einsum("nsd,de->nse", o, f32(st["wout"][l]),
                       precision="highest") + st["bout"][l]
        y = y + o
        h = _layernorm(y, st["ln2_g"][l], st["ln2_b"][l])
        h = jnp.einsum("nsd,dm->nsm", h, f32(st["w1"][l]),
                       precision="highest") + st["b1"][l]
        h = _gelu_exact(h)
        h = jnp.einsum("nsm,md->nsd", h, f32(st["w2"][l]),
                       precision="highest") + st["b2"][l]
        y = y + h
    hp = params["head"]
    h = _layernorm(y[:, 0], hp["ln_g"], hp["ln_b"])
    h = jnp.dot(h, f32(hp["w1"]), precision="highest") + hp["b1"]
    return jnp.dot(h, f32(hp["w2"]), precision="highest") + hp["b2"]


# ---------------------------------------------------------------------------
# Deterministic parameter init (synthetic; shapes follow the module __init__,
# per-layer tensors are stacked with a leading layer dim, matmul weights bf16)
# ---------------------------------------------------------------------------
def init_params(key, cfg):
    c, p, D = cfg["c"], cfg["p"], cfg["dim"]
    M, L, dim_out = cfg["mlp"], cfg["n_layers"], cfg["dim_out"]
    n_emb = (cfg["h"] // p) * (cfg["w"] // p)
    patch_dim = p * p * c
    kit = iter(jax.random.split(key, 24))

    def rnd(shape, dtype=jnp.float32, scale=0.02):
        return (scale * jax.random.normal(next(kit), shape)).astype(dtype)

    ones = lambda s: jnp.ones(s, jnp.float32)
    zeros = lambda s: jnp.zeros(s, jnp.float32)
    bf = jnp.bfloat16

    return {
        "patch_embedding": rnd((patch_dim, D), bf),
        "class_token": rnd((1, 1, D)),
        "pos_embedding": rnd((1, n_emb + 1, D)),
        "ln0_g": ones((1, D)), "ln0_b": zeros((1, D)),
        "layers": {
            "ln1_g": ones((L, 1, D)), "ln1_b": zeros((L, 1, D)),
            "wqkv": rnd((L, D, 3 * D), bf), "bqkv": rnd((L, 1, 3 * D)),
            "wout": rnd((L, D, D), bf), "bout": rnd((L, 1, D)),
            "ln2_g": ones((L, 1, D)), "ln2_b": zeros((L, 1, D)),
            "w1": rnd((L, D, M), bf), "b1": rnd((L, 1, M)),
            "w2": rnd((L, M, D), bf), "b2": rnd((L, 1, D)),
        },
        "head": {
            "ln_g": ones((1, D)), "ln_b": zeros((1, D)),
            "w1": rnd((D, M), bf), "b1": rnd((1, M)),
            "w2": rnd((M, dim_out), bf), "b2": rnd((1, dim_out)),
        },
    }


if __name__ == "__main__":
    # Scaled-down config (real module: h=w=224, p=32, dim=768, mlp=4096,
    # nhead=12, n_layers=12, batch_tile=8).  Forward semantics identical.
    cfg = dict(c=3, h=64, w=64, p=32, dim=128, mlp=256,
               nhead=4, n_layers=2, dim_out=16, batch_tile=4)

    key = jax.random.PRNGKey(0)
    kp, kx = jax.random.split(key)
    params = init_params(kp, cfg)
    x = jax.random.normal(kx, (2, cfg["c"], cfg["h"], cfg["w"]),
                          dtype=jnp.float32)

    fwd = jax.jit(lambda xx, pp: vit_forward(xx, pp, cfg))
    ref_fn = jax.jit(lambda xx, pp: vit_forward_ref(xx, pp, cfg))

    out = jax.block_until_ready(fwd(x, params))
    ref = jax.block_until_ready(ref_fn(x, params))

    assert out.shape == (2, cfg["dim_out"]), out.shape
    assert bool(jnp.isfinite(out).all())
    err = float(jnp.max(jnp.abs(out - ref)))
    assert err < 5e-2, f"mismatch vs pure-JAX reference: {err}"
    print("KERNEL_OK")
</pallas_src>

<mosaic_0001>
module attributes {stable_mosaic.version = 11 : i64} {
  func.func @_patch_embed_kernel(%arg0: i32, %arg1: memref<8x3072xbf16, #tpu.memory_space<vmem>>, %arg2: memref<3072x128xbf16, #tpu.memory_space<vmem>>, %arg3: memref<8x128xf32, #tpu.memory_space<vmem>>) attributes {dimension_semantics = [#tpu.dimension_semantics<parallel>], iteration_bounds = array<i64: 1>, scalar_prefetch = 0 : i64, scratch_operands = 0 : i64, tpu.core_type = #tpu.core_type<tc>, window_params = [{transform_indices = @transform_0, window_bounds = array<i64: 8, 3072>}, {pipeline_mode = #tpu.pipeline_mode<synchronous>, transform_indices = @transform_1, window_bounds = array<i64: 3072, 128>}, {transform_indices = @transform_2, window_bounds = array<i64: 8, 128>}]} {
    %c0 = arith.constant 0 : index
    %c0_0 = arith.constant 0 : index
    %0 = vector.load %arg1[%c0, %c0_0] : memref<8x3072xbf16, #tpu.memory_space<vmem>>, vector<8x3072xbf16>
    %c0_1 = arith.constant 0 : index
    %c0_2 = arith.constant 0 : index
    %1 = vector.load %arg2[%c0_1, %c0_2] : memref<3072x128xbf16, #tpu.memory_space<vmem>>, vector<3072x128xbf16>
    %cst = arith.constant dense<0.000000e+00> : vector<8x128xf32>
    %2 = tpu.matmul %0, %1, %cst {dimension_numbers = #tpu.dot_dimension_numbers<[1], [0], [0], [1], [0, 0, 1, 1], [], []>} : vector<8x3072xbf16>, vector<3072x128xbf16>, vector<8x128xf32> -> vector<8x128xf32>
    %c0_3 = arith.constant 0 : index
    %c0_4 = arith.constant 0 : index
    %3 = vector.load %arg3[%c0_3, %c0_4] : memref<8x128xf32, #tpu.memory_space<vmem>>, vector<8x128xf32>
    tpu.vector_store %arg3[%c0_3, %c0_4], %2 {strides = array<i32>} : memref<8x128xf32, #tpu.memory_space<vmem>>, vector<8x128xf32>,
    return
  }
  func.func @transform_0(%arg0: i32) -> (i32, i32) {
    %c0_i32 = arith.constant 0 : i32
    %c0_i32_0 = arith.constant 0 : i32
    return %arg0, %c0_i32 : i32, i32
  }
  func.func @transform_1(%arg0: i32) -> (i32, i32) {
    %c0_i32 = arith.constant 0 : i32
    %c0_i32_0 = arith.constant 0 : i32
    %c0_i32_1 = arith.constant 0 : i32
    return %c0_i32, %c0_i32_0 : i32, i32
  }
  func.func @transform_2(%arg0: i32) -> (i32, i32) {
    %c0_i32 = arith.constant 0 : i32
    %c0_i32_0 = arith.constant 0 : i32
    return %arg0, %c0_i32 : i32, i32
  }
}

module attributes {stable_mosaic.version = 11 : i64} {
  func.func @_encoder_stack_kernel(%arg0: i32, %arg1: memref<16x128xf32, #tpu.memory_space<vmem>>, %arg2: memref<16x16xf32, #tpu.memory_space<vmem>>, %arg3: memref<1x128xf32, #tpu.memory_space<vmem>>, %arg4: memref<1x128xf32, #tpu.memory_space<vmem>>, %arg5: memref<1x1x128xf32, #tpu.memory_space<vmem>>, %arg6: memref<1x1x128xf32, #tpu.memory_space<vmem>>, %arg7: memref<1x128x384xbf16, #tpu.memory_space<vmem>>, %arg8: memref<1x1x384xf32, #tpu.memory_space<vmem>>, %arg9: memref<1x128x128xbf16, #tpu.memory_space<vmem>>, %arg10: memref<1x1x128xf32, #tpu.memory_space<vmem>>, %arg11: memref<1x1x128xf32, #tpu.memory_space<vmem>>, %arg12: memref<1x1x128xf32, #tpu.memory_space<vmem>>, %arg13: memref<1x128x256xbf16, #tpu.memory_space<vmem>>, %arg14: memref<1x1x256xf32, #tpu.memory_space<vmem>>, %arg15: memref<1x256x128xbf16, #tpu.memory_space<vmem>>, %arg16: memref<1x1x128xf32, #tpu.memory_space<vmem>>, %arg17: memref<16x128xf32, #tpu.memory_space<vmem>>, %arg18: memref<16x384xf32, #tpu.memory_space<vmem>>, %arg19: memref<16x128xf32, #tpu.memory_space<vmem>>) attributes {dimension_semantics = [#tpu.dimension_semantics<arbitrary>], iteration_bounds = array<i64: 2>, scalar_prefetch = 0 : i64, scratch_operands = 2 : i64, tpu.core_type = #tpu.core_type<tc>, window_params = [{pipeline_mode = #tpu.pipeline_mode<synchronous>, transform_indices = @transform_0, window_bounds = array<i64: 16, 128>}, {pipeline_mode = #tpu.pipeline_mode<synchronous>, transform_indices = @transform_1, window_bounds = array<i64: 16, 16>}, {pipeline_mode = #tpu.pipeline_mode<synchronous>, transform_indices = @transform_2, window_bounds = array<i64: 1, 128>}, {pipeline_mode = #tpu.pipeline_mode<synchronous>, transform_indices = @transform_3, window_bounds = array<i64: 1, 128>}, {transform_indices = @transform_4, window_bounds = array<i64: 1, 1, 128>}, {transform_indices = @transform_5, window_bounds = array<i64: 1, 1, 128>}, {transform_indices = @transform_6, window_bounds = array<i64: 1, 128, 384>}, {transform_indices = @transform_7, window_bounds = array<i64: 1, 1, 384>}, {transform_indices = @transform_8, window_bounds = array<i64: 1, 128, 128>}, {transform_indices = @transform_9, window_bounds = array<i64: 1, 1, 128>}, {transform_indices = @transform_10, window_bounds = array<i64: 1, 1, 128>}, {transform_indices = @transform_11, window_bounds = array<i64: 1, 1, 128>}, {transform_indices = @transform_12, window_bounds = array<i64: 1, 128, 256>}, {transform_indices = @transform_13, window_bounds = array<i64: 1, 1, 256>}, {transform_indices = @transform_14, window_bounds = array<i64: 1, 256, 128>}, {transform_indices = @transform_15, window_bounds = array<i64: 1, 1, 128>}, {pipeline_mode = #tpu.pipeline_mode<synchronous>, transform_indices = @transform_16, window_bounds = array<i64: 16, 128>}]} {
    %c0_i32 = arith.constant 0 : i32
    %0 = arith.cmpi eq, %arg0, %c0_i32 : i32
    %1 = arith.extui %0 : i1 to i32
    %c0_i32_0 = arith.constant 0 : i32
    %2 = arith.cmpi ne, %1, %c0_i32_0 : i32
    scf.if %2 {
      %c0_99 = arith.constant 0 : index
      %c0_100 = arith.constant 0 : index
      %178 = vector.load %arg1[%c0_99, %c0_100] : memref<16x128xf32, #tpu.memory_space<vmem>>, vector<16x128xf32>
      %c0_101 = arith.constant 0 : index
      %c0_102 = arith.constant 0 : index
      %179 = vector.load %arg3[%c0_101, %c0_102] : memref<1x128xf32, #tpu.memory_space<vmem>>, vector<1x128xf32>
      %c0_103 = arith.constant 0 : index
      %c0_104 = arith.constant 0 : index
      %180 = vector.load %arg4[%c0_103, %c0_104] : memref<1x128xf32, #tpu.memory_space<vmem>>, vector<1x128xf32>
      %cst_105 = arith.constant dense<0.000000e+00> : vector<16xf32>
      %181 = vector.multi_reduction <add>, %178, %cst_105 [1] : vector<16x128xf32> to vector<16xf32>
      %182 = vector.shape_cast %181 : vector<16xf32> to vector<16x1xf32>
      %cst_106 = arith.constant 1.280000e+02 : f32
      %183 = vector.broadcast %cst_106 : f32 to vector<16x1xf32>
      %184 = arith.divf %182, %183 : vector<16x1xf32>
      %185 = vector.broadcast %184 : vector<16x1xf32> to vector<16x128xf32>
      %186 = arith.subf %178, %185 : vector<16x128xf32>
      %187 = arith.mulf %186, %186 : vector<16x128xf32>
      %cst_107 = arith.constant dense<0.000000e+00> : vector<16xf32>
      %188 = vector.multi_reduction <add>, %187, %cst_107 [1] : vector<16x128xf32> to vector<16xf32>
      %189 = vector.shape_cast %188 : vector<16xf32> to vector<16x1xf32>
      %cst_108 = arith.constant 1.280000e+02 : f32
      %190 = vector.broadcast %cst_108 : f32 to vector<16x1xf32>
      %191 = arith.divf %189, %190 : vector<16x1xf32>
      %192 = vector.broadcast %184 : vector<16x1xf32> to vector<16x128xf32>
      %193 = arith.subf %178, %192 : vector<16x128xf32>
      %cst_109 = arith.constant 9.99999974E-6 : f32
      %194 = vector.broadcast %cst_109 : f32 to vector<16x1xf32>
      %195 = arith.addf %191, %194 : vector<16x1xf32>
      %196 = math.rsqrt %195 : vector<16x1xf32>
      %197 = vector.broadcast %196 : vector<16x1xf32> to vector<16x128xf32>
      %198 = arith.mulf %193, %197 : vector<16x128xf32>
      %199 = vector.broadcast %179 : vector<1x128xf32> to vector<16x128xf32>
      %200 = arith.mulf %198, %199 : vector<16x128xf32>
      %201 = vector.broadcast %180 : vector<1x128xf32> to vector<16x128xf32>
      %202 = arith.addf %200, %201 : vector<16x128xf32>
      %c0_110 = arith.constant 0 : index
      %c0_111 = arith.constant 0 : index
      %203 = vector.load %arg17[%c0_110, %c0_111] : memref<16x128xf32, #tpu.memory_space<vmem>>, vector<16x128xf32>
      tpu.vector_store %arg17[%c0_110, %c0_111], %202 {strides = array<i32>} : memref<16x128xf32, #tpu.memory_space<vmem>>, vector<16x128xf32>,
    } else {
    }
    %c0 = arith.constant 0 : index
    %c0_1 = arith.constant 0 : index
    %3 = vector.load %arg2[%c0, %c0_1] : memref<16x16xf32, #tpu.memory_space<vmem>>, vector<16x16xf32>
    %c0_2 = arith.constant 0 : index
    %c0_3 = arith.constant 0 : index
    %4 = vector.load %arg17[%c0_2, %c0_3] : memref<16x128xf32, #tpu.memory_space<vmem>>, vector<16x128xf32>
    %c0_4 = arith.constant 0 : index
    %c0_5 = arith.constant 0 : index
    %c0_6 = arith.constant 0 : index
    %5 = vector.load %arg5[%c0_4, %c0_5, %c0_6] : memref<1x1x128xf32, #tpu.memory_space<vmem>>, vector<1x1x128xf32>
    %6 = vector.shape_cast %5 : vector<1x1x128xf32> to vector<1x128xf32>
    %c0_7 = arith.constant 0 : index
    %c0_8 = arith.constant 0 : index
    %c0_9 = arith.constant 0 : index
    %7 = vector.load %arg6[%c0_7, %c0_8, %c0_9] : memref<1x1x128xf32, #tpu.memory_space<vmem>>, vector<1x1x128xf32>
    %8 = vector.shape_cast %7 : vector<1x1x128xf32> to vector<1x128xf32>
    %cst = arith.constant dense<0.000000e+00> : vector<16xf32>
    %9 = vector.multi_reduction <add>, %4, %cst [1] : vector<16x128xf32> to vector<16xf32>
    %10 = vector.shape_cast %9 : vector<16xf32> to vector<16x1xf32>
    %cst_10 = arith.constant 1.280000e+02 : f32
    %11 = vector.broadcast %cst_10 : f32 to vector<16x1xf32>
    %12 = arith.divf %10, %11 : vector<16x1xf32>
    %13 = vector.broadcast %12 : vector<16x1xf32> to vector<16x128xf32>
    %14 = arith.subf %4, %13 : vector<16x128xf32>
    %15 = arith.mulf %14, %14 : vector<16x128xf32>
    %cst_11 = arith.constant dense<0.000000e+00> : vector<16xf32>
    %16 = vector.multi_reduction <add>, %15, %cst_11 [1] : vector<16x128xf32> to vector<16xf32>
    %17 = vector.shape_cast %16 : vector<16xf32> to vector<16x1xf32>
    %cst_12 = arith.constant 1.280000e+02 : f32
    %18 = vector.broadcast %cst_12 : f32 to vector<16x1xf32>
    %19 = arith.divf %17, %18 : vector<16x1xf32>
    %20 = vector.broadcast %12 : vector<16x1xf32> to vector<16x128xf32>
    %21 = arith.subf %4, %20 : vector<16x128xf32>
    %cst_13 = arith.constant 9.99999974E-6 : f32
    %22 = vector.broadcast %cst_13 : f32 to vector<16x1xf32>
    %23 = arith.addf %19, %22 : vector<16x1xf32>
    %24 = math.rsqrt %23 : vector<16x1xf32>
    %25 = vector.broadcast %24 : vector<16x1xf32> to vector<16x128xf32>
    %26 = arith.mulf %21, %25 : vector<16x128xf32>
    %27 = vector.broadcast %6 : vector<1x128xf32> to vector<16x128xf32>
    %28 = arith.mulf %26, %27 : vector<16x128xf32>
    %29 = vector.broadcast %8 : vector<1x128xf32> to vector<16x128xf32>
    %30 = arith.addf %28, %29 : vector<16x128xf32>
    %31 = arith.truncf %30 : vector<16x128xf32> to vector<16x128xbf16>
    %c0_14 = arith.constant 0 : index
    %c0_15 = arith.constant 0 : index
    %c0_16 = arith.constant 0 : index
    %32 = vector.load %arg7[%c0_14, %c0_15, %c0_16] : memref<1x128x384xbf16, #tpu.memory_space<vmem>>, vector<1x128x384xbf16>
    %33 = vector.shape_cast %32 : vector<1x128x384xbf16> to vector<128x384xbf16>
    %cst_17 = arith.constant dense<0.000000e+00> : vector<16x384xf32>
    %34 = tpu.matmul %31, %33, %cst_17 {dimension_numbers = #tpu.dot_dimension_numbers<[1], [0], [0], [1], [0, 0, 1, 1], [], []>} : vector<16x128xbf16>, vector<128x384xbf16>, vector<16x384xf32> -> vector<16x384xf32>
    %c0_18 = arith.constant 0 : index
    %c0_19 = arith.constant 0 : index
    %c0_20 = arith.constant 0 : index
    %35 = vector.load %arg8[%c0_18, %c0_19, %c0_20] : memref<1x1x384xf32, #tpu.memory_space<vmem>>, vector<1x1x384xf32>
    %36 = vector.shape_cast %35 : vector<1x1x384xf32> to vector<1x384xf32>
    %37 = vector.broadcast %36 : vector<1x384xf32> to vector<16x384xf32>
    %38 = arith.addf %34, %37 : vector<16x384xf32>
    %c0_21 = arith.constant 0 : index
    %c0_22 = arith.constant 0 : index
    %39 = vector.load %arg18[%c0_21, %c0_22] : memref<16x384xf32, #tpu.memory_space<vmem>>, vector<16x384xf32>
    tpu.vector_store %arg18[%c0_21, %c0_22], %38 {strides = array<i32>} : memref<16x384xf32, #tpu.memory_space<vmem>>, vector<16x384xf32>,
    %c0_23 = arith.constant 0 : index
    %c0_24 = arith.constant 0 : index
    %40 = vector.load %arg18[%c0_23, %c0_24] : memref<16x384xf32, #tpu.memory_space<vmem>>, vector<16x32xf32>
    %c0_25 = arith.constant 0 : index
    %c128 = arith.constant 128 : index
    %41 = vector.load %arg18[%c0_25, %c128] : memref<16x384xf32, #tpu.memory_space<vmem>>, vector<16x32xf32>
    %c0_26 = arith.constant 0 : index
    %c256 = arith.constant 256 : index
    %42 = vector.load %arg18[%c0_26, %c256] : memref<16x384xf32, #tpu.memory_space<vmem>>, vector<16x32xf32>
    %cst_27 = arith.constant dense<0.000000e+00> : vector<16x16xf32>
    %43 = tpu.matmul %40, %41, %cst_27 {dimension_numbers = #tpu.dot_dimension_numbers<[1], [1], [0], [0], [0, 0, 1, 0], [], []>} : vector<16x32xf32>, vector<16x32xf32>, vector<16x16xf32> -> vector<16x16xf32>
    %cst_28 = arith.constant 0.176776692 : f32
    %44 = vector.broadcast %cst_28 : f32 to vector<16x16xf32>
    %45 = arith.mulf %43, %44 : vector<16x16xf32>
    %46 = arith.addf %45, %3 : vector<16x16xf32>
    %cst_29 = arith.constant dense<0xFF800000> : vector<16xf32>
    %47 = vector.multi_reduction <maximumf>, %46, %cst_29 [1] : vector<16x16xf32> to vector<16xf32>
    %48 = vector.shape_cast %47 : vector<16xf32> to vector<16x1xf32>
    %49 = vector.broadcast %48 : vector<16x1xf32> to vector<16x16xf32>
    %50 = arith.subf %46, %49 : vector<16x16xf32>
    %51 = math.exp %50 : vector<16x16xf32>
    %cst_30 = arith.constant dense<0.000000e+00> : vector<16xf32>
    %52 = vector.multi_reduction <add>, %51, %cst_30 [1] : vector<16x16xf32> to vector<16xf32>
    %53 = vector.shape_cast %52 : vector<16xf32> to vector<16x1xf32>
    %54 = tpu.reciprocal %53 : vector<16x1xf32> -> vector<16x1xf32>
    %55 = vector.broadcast %54 : vector<16x1xf32> to vector<16x16xf32>
    %56 = arith.mulf %51, %55 : vector<16x16xf32>
    %cst_31 = arith.constant dense<0.000000e+00> : vector<16x32xf32>
    %57 = tpu.matmul %56, %42, %cst_31 {dimension_numbers = #tpu.dot_dimension_numbers<[1], [0], [0], [1], [0, 0, 1, 1], [], []>} : vector<16x16xf32>, vector<16x32xf32>, vector<16x32xf32> -> vector<16x32xf32>
    %c0_32 = arith.constant 0 : index
    %c32 = arith.constant 32 : index
    %58 = vector.load %arg18[%c0_32, %c32] : memref<16x384xf32, #tpu.memory_space<vmem>>, vector<16x32xf32>
    %c0_33 = arith.constant 0 : index
    %c160 = arith.constant 160 : index
    %59 = vector.load %arg18[%c0_33, %c160] : memref<16x384xf32, #tpu.memory_space<vmem>>, vector<16x32xf32>
    %c0_34 = arith.constant 0 : index
    %c288 = arith.constant 288 : index
    %60 = vector.load %arg18[%c0_34, %c288] : memref<16x384xf32, #tpu.memory_space<vmem>>, vector<16x32xf32>
    %cst_35 = arith.constant dense<0.000000e+00> : vector<16x16xf32>
    %61 = tpu.matmul %58, %59, %cst_35 {dimension_numbers = #tpu.dot_dimension_numbers<[1], [1], [0], [0], [0, 0, 1, 0], [], []>} : vector<16x32xf32>, vector<16x32xf32>, vector<16x16xf32> -> vector<16x16xf32>
    %cst_36 = arith.constant 0.176776692 : f32
    %62 = vector.broadcast %cst_36 : f32 to vector<16x16xf32>
    %63 = arith.mulf %61, %62 : vector<16x16xf32>
    %64 = arith.addf %63, %3 : vector<16x16xf32>
    %cst_37 = arith.constant dense<0xFF800000> : vector<16xf32>
    %65 = vector.multi_reduction <maximumf>, %64, %cst_37 [1] : vector<16x16xf32> to vector<16xf32>
    %66 = vector.shape_cast %65 : vector<16xf32> to vector<16x1xf32>
    %67 = vector.broadcast %66 : vector<16x1xf32> to vector<16x16xf32>
    %68 = arith.subf %64, %67 : vector<16x16xf32>
    %69 = math.exp %68 : vector<16x16xf32>
    %cst_38 = arith.constant dense<0.000000e+00> : vector<16xf32>
    %70 = vector.multi_reduction <add>, %69, %cst_38 [1] : vector<16x16xf32> to vector<16xf32>
    %71 = vector.shape_cast %70 : vector<16xf32> to vector<16x1xf32>
    %72 = tpu.reciprocal %71 : vector<16x1xf32> -> vector<16x1xf32>
    %73 = vector.broadcast %72 : vector<16x1xf32> to vector<16x16xf32>
    %74 = arith.mulf %69, %73 : vector<16x16xf32>
    %cst_39 = arith.constant dense<0.000000e+00> : vector<16x32xf32>
    %75 = tpu.matmul %74, %60, %cst_39 {dimension_numbers = #tpu.dot_dimension_numbers<[1], [0], [0], [1], [0, 0, 1, 1], [], []>} : vector<16x16xf32>, vector<16x32xf32>, vector<16x32xf32> -> vector<16x32xf32>
    %76 = tpu.concatenate %57, %75 in 1 : vector<16x32xf32>, vector<16x32xf32> -> vector<16x64xf32>
    %c0_40 = arith.constant 0 : index
    %c0_41 = arith.constant 0 : index
    %77 = vector.load %arg19[%c0_40, %c0_41] : memref<16x128xf32, #tpu.memory_space<vmem>>, vector<16x64xf32>
    tpu.vector_store %arg19[%c0_40, %c0_41], %76 {strides = array<i32>} : memref<16x128xf32, #tpu.memory_space<vmem>>, vector<16x64xf32>,
    %c0_42 = arith.constant 0 : index
    %c64 = arith.constant 64 : index
    %78 = vector.load %arg18[%c0_42, %c64] : memref<16x384xf32, #tpu.memory_space<vmem>>, vector<16x32xf32>
    %c0_43 = arith.constant 0 : index
    %c192 = arith.constant 192 : index
    %79 = vector.load %arg18[%c0_43, %c192] : memref<16x384xf32, #tpu.memory_space<vmem>>, vector<16x32xf32>
    %c0_44 = arith.constant 0 : index
    %c320 = arith.constant 320 : index
    %80 = vector.load %arg18[%c0_44, %c320] : memref<16x384xf32, #tpu.memory_space<vmem>>, vector<16x32xf32>
    %cst_45 = arith.constant dense<0.000000e+00> : vector<16x16xf32>
    %81 = tpu.matmul %78, %79, %cst_45 {dimension_numbers = #tpu.dot_dimension_numbers<[1], [1], [0], [0], [0, 0, 1, 0], [], []>} : vector<16x32xf32>, vector<16x32xf32>, vector<16x16xf32> -> vector<16x16xf32>
    %cst_46 = arith.constant 0.176776692 : f32
    %82 = vector.broadcast %cst_46 : f32 to vector<16x16xf32>
    %83 = arith.mulf %81, %82 : vector<16x16xf32>
    %84 = arith.addf %83, %3 : vector<16x16xf32>
    %cst_47 = arith.constant dense<0xFF800000> : vector<16xf32>
    %85 = vector.multi_reduction <maximumf>, %84, %cst_47 [1] : vector<16x16xf32> to vector<16xf32>
    %86 = vector.shape_cast %85 : vector<16xf32> to vector<16x1xf32>
    %87 = vector.broadcast %86 : vector<16x1xf32> to vector<16x16xf32>
    %88 = arith.subf %84, %87 : vector<16x16xf32>
    %89 = math.exp %88 : vector<16x16xf32>
    %cst_48 = arith.constant dense<0.000000e+00> : vector<16xf32>
    %90 = vector.multi_reduction <add>, %89, %cst_48 [1] : vector<16x16xf32> to vector<16xf32>
    %91 = vector.shape_cast %90 : vector<16xf32> to vector<16x1xf32>
    %92 = tpu.reciprocal %91 : vector<16x1xf32> -> vector<16x1xf32>
    %93 = vector.broadcast %92 : vector<16x1xf32> to vector<16x16xf32>
    %94 = arith.mulf %89, %93 : vector<16x16xf32>
    %cst_49 = arith.constant dense<0.000000e+00> : vector<16x32xf32>
    %95 = tpu.matmul %94, %80, %cst_49 {dimension_numbers = #tpu.dot_dimension_numbers<[1], [0], [0], [1], [0, 0, 1, 1], [], []>} : vector<16x16xf32>, vector<16x32xf32>, vector<16x32xf32> -> vector<16x32xf32>
    %c0_50 = arith.constant 0 : index
    %c96 = arith.constant 96 : index
    %96 = vector.load %arg18[%c0_50, %c96] : memref<16x384xf32, #tpu.memory_space<vmem>>, vector<16x32xf32>
    %c0_51 = arith.constant 0 : index
    %c224 = arith.constant 224 : index
    %97 = vector.load %arg18[%c0_51, %c224] : memref<16x384xf32, #tpu.memory_space<vmem>>, vector<16x32xf32>
    %c0_52 = arith.constant 0 : index
    %c352 = arith.constant 352 : index
    %98 = vector.load %arg18[%c0_52, %c352] : memref<16x384xf32, #tpu.memory_space<vmem>>, vector<16x32xf32>
    %cst_53 = arith.constant dense<0.000000e+00> : vector<16x16xf32>
    %99 = tpu.matmul %96, %97, %cst_53 {dimension_numbers = #tpu.dot_dimension_numbers<[1], [1], [0], [0], [0, 0, 1, 0], [], []>} : vector<16x32xf32>, vector<16x32xf32>, vector<16x16xf32> -> vector<16x16xf32>
    %cst_54 = arith.constant 0.176776692 : f32
    %100 = vector.broadcast %cst_54 : f32 to vector<16x16xf32>
    %101 = arith.mulf %99, %100 : vector<16x16xf32>
    %102 = arith.addf %101, %3 : vector<16x16xf32>
    %cst_55 = arith.constant dense<0xFF800000> : vector<16xf32>
    %103 = vector.multi_reduction <maximumf>, %102, %cst_55 [1] : vector<16x16xf32> to vector<16xf32>
    %104 = vector.shape_cast %103 : vector<16xf32> to vector<16x1xf32>
    %105 = vector.broadcast %104 : vector<16x1xf32> to vector<16x16xf32>
    %106 = arith.subf %102, %105 : vector<16x16xf32>
    %107 = math.exp %106 : vector<16x16xf32>
    %cst_56 = arith.constant dense<0.000000e+00> : vector<16xf32>
    %108 = vector.multi_reduction <add>, %107, %cst_56 [1] : vector<16x16xf32> to vector<16xf32>
    %109 = vector.shape_cast %108 : vector<16xf32> to vector<16x1xf32>
    %110 = tpu.reciprocal %109 : vector<16x1xf32> -> vector<16x1xf32>
    %111 = vector.broadcast %110 : vector<16x1xf32> to vector<16x16xf32>
    %112 = arith.mulf %107, %111 : vector<16x16xf32>
    %cst_57 = arith.constant dense<0.000000e+00> : vector<16x32xf32>
    %113 = tpu.matmul %112, %98, %cst_57 {dimension_numbers = #tpu.dot_dimension_numbers<[1], [0], [0], [1], [0, 0, 1, 1], [], []>} : vector<16x16xf32>, vector<16x32xf32>, vector<16x32xf32> -> vector<16x32xf32>
    %114 = tpu.concatenate %95, %113 in 1 : vector<16x32xf32>, vector<16x32xf32> -> vector<16x64xf32>
    %c0_58 = arith.constant 0 : index
    %c64_59 = arith.constant 64 : index
    %115 = vector.load %arg19[%c0_58, %c64_59] : memref<16x128xf32, #tpu.memory_space<vmem>>, vector<16x64xf32>
    tpu.vector_store %arg19[%c0_58, %c64_59], %114 {strides = array<i32>} : memref<16x128xf32, #tpu.memory_space<vmem>>, vector<16x64xf32>,
    %c0_60 = arith.constant 0 : index
    %c0_61 = arith.constant 0 : index
    %116 = vector.load %arg19[%c0_60, %c0_61] : memref<16x128xf32, #tpu.memory_space<vmem>>, vector<16x128xf32>
    %117 = arith.truncf %116 : vector<16x128xf32> to vector<16x128xbf16>
    %c0_62 = arith.constant 0 : index
    %c0_63 = arith.constant 0 : index
    %c0_64 = arith.constant 0 : index
    %118 = vector.load %arg9[%c0_62, %c0_63, %c0_64] : memref<1x128x128xbf16, #tpu.memory_space<vmem>>, vector<1x128x128xbf16>
    %119 = vector.shape_cast %118 : vector<1x128x128xbf16> to vector<128x128xbf16>
    %cst_65 = arith.constant dense<0.000000e+00> : vector<16x128xf32>
    %120 = tpu.matmul %117, %119, %cst_65 {dimension_numbers = #tpu.dot_dimension_numbers<[1], [0], [0], [1], [0, 0, 1, 1], [], []>} : vector<16x128xbf16>, vector<128x128xbf16>, vector<16x128xf32> -> vector<16x128xf32>
    %c0_66 = arith.constant 0 : index
    %c0_67 = arith.constant 0 : index
    %c0_68 = arith.constant 0 : index
    %121 = vector.load %arg10[%c0_66, %c0_67, %c0_68] : memref<1x1x128xf32, #tpu.memory_space<vmem>>, vector<1x1x128xf32>
    %122 = vector.shape_cast %121 : vector<1x1x128xf32> to vector<1x128xf32>
    %123 = vector.broadcast %122 : vector<1x128xf32> to vector<16x128xf32>
    %124 = arith.addf %120, %123 : vector<16x128xf32>
    %125 = arith.addf %4, %124 : vector<16x128xf32>
    %c0_69 = arith.constant 0 : index
    %c0_70 = arith.constant 0 : index
    %c0_71 = arith.constant 0 : index
    %126 = vector.load %arg11[%c0_69, %c0_70, %c0_71] : memref<1x1x128xf32, #tpu.memory_space<vmem>>, vector<1x1x128xf32>
    %127 = vector.shape_cast %126 : vector<1x1x128xf32> to vector<1x128xf32>
    %c0_72 = arith.constant 0 : index
    %c0_73 = arith.constant 0 : index
    %c0_74 = arith.constant 0 : index
    %128 = vector.load %arg12[%c0_72, %c0_73, %c0_74] : memref<1x1x128xf32, #tpu.memory_space<vmem>>, vector<1x1x128xf32>
    %129 = vector.shape_cast %128 : vector<1x1x128xf32> to vector<1x128xf32>
    %cst_75 = arith.constant dense<0.000000e+00> : vector<16xf32>
    %130 = vector.multi_reduction <add>, %125, %cst_75 [1] : vector<16x128xf32> to vector<16xf32>
    %131 = vector.shape_cast %130 : vector<16xf32> to vector<16x1xf32>
    %cst_76 = arith.constant 1.280000e+02 : f32
    %132 = vector.broadcast %cst_76 : f32 to vector<16x1xf32>
    %133 = arith.divf %131, %132 : vector<16x1xf32>
    %134 = vector.broadcast %133 : vector<16x1xf32> to vector<16x128xf32>
    %135 = arith.subf %125, %134 : vector<16x128xf32>
    %136 = arith.mulf %135, %135 : vector<16x128xf32>
    %cst_77 = arith.constant dense<0.000000e+00> : vector<16xf32>
    %137 = vector.multi_reduction <add>, %136, %cst_77 [1] : vector<16x128xf32> to vector<16xf32>
    %138 = vector.shape_cast %137 : vector<16xf32> to vector<16x1xf32>
    %cst_78 = arith.constant 1.280000e+02 : f32
    %139 = vector.broadcast %cst_78 : f32 to vector<16x1xf32>
    %140 = arith.divf %138, %139 : vector<16x1xf32>
    %141 = vector.broadcast %133 : vector<16x1xf32> to vector<16x128xf32>
    %142 = arith.subf %125, %141 : vector<16x128xf32>
    %cst_79 = arith.constant 9.99999974E-6 : f32
    %143 = vector.broadcast %cst_79 : f32 to vector<16x1xf32>
    %144 = arith.addf %140, %143 : vector<16x1xf32>
    %145 = math.rsqrt %144 : vector<16x1xf32>
    %146 = vector.broadcast %145 : vector<16x1xf32> to vector<16x128xf32>
    %147 = arith.mulf %142, %146 : vector<16x128xf32>
    %148 = vector.broadcast %127 : vector<1x128xf32> to vector<16x128xf32>
    %149 = arith.mulf %147, %148 : vector<16x128xf32>
    %150 = vector.broadcast %129 : vector<1x128xf32> to vector<16x128xf32>
    %151 = arith.addf %149, %150 : vector<16x128xf32>
    %152 = arith.truncf %151 : vector<16x128xf32> to vector<16x128xbf16>
    %c0_80 = arith.constant 0 : index
    %c0_81 = arith.constant 0 : index
    %c0_82 = arith.constant 0 : index
    %153 = vector.load %arg13[%c0_80, %c0_81, %c0_82] : memref<1x128x256xbf16, #tpu.memory_space<vmem>>, vector<1x128x256xbf16>
    %154 = vector.shape_cast %153 : vector<1x128x256xbf16> to vector<128x256xbf16>
    %cst_83 = arith.constant dense<0.000000e+00> : vector<16x256xf32>
    %155 = tpu.matmul %152, %154, %cst_83 {dimension_numbers = #tpu.dot_dimension_numbers<[1], [0], [0], [1], [0, 0, 1, 1], [], []>} : vector<16x128xbf16>, vector<128x256xbf16>, vector<16x256xf32> -> vector<16x256xf32>
    %c0_84 = arith.constant 0 : index
    %c0_85 = arith.constant 0 : index
    %c0_86 = arith.constant 0 : index
    %156 = vector.load %arg14[%c0_84, %c0_85, %c0_86] : memref<1x1x256xf32, #tpu.memory_space<vmem>>, vector<1x1x256xf32>
    %157 = vector.shape_cast %156 : vector<1x1x256xf32> to vector<1x256xf32>
    %158 = vector.broadcast %157 : vector<1x256xf32> to vector<16x256xf32>
    %159 = arith.addf %155, %158 : vector<16x256xf32>
    %cst_87 = arith.constant 5.000000e-01 : f32
    %160 = vector.broadcast %cst_87 : f32 to vector<16x256xf32>
    %161 = arith.mulf %160, %159 : vector<16x256xf32>
    %cst_88 = arith.constant 0.707106769 : f32
    %162 = vector.broadcast %cst_88 : f32 to vector<16x256xf32>
    %163 = arith.mulf %159, %162 : vector<16x256xf32>
    %164 = math.erf %163 : vector<16x256xf32>
    %cst_89 = arith.constant 1.000000e+00 : f32
    %165 = vector.broadcast %cst_89 : f32 to vector<16x256xf32>
    %166 = arith.addf %165, %164 : vector<16x256xf32>
    %167 = arith.mulf %161, %166 : vector<16x256xf32>
    %168 = arith.truncf %167 : vector<16x256xf32> to vector<16x256xbf16>
    %c0_90 = arith.constant 0 : index
    %c0_91 = arith.constant 0 : index
    %c0_92 = arith.constant 0 : index
    %169 = vector.load %arg15[%c0_90, %c0_91, %c0_92] : memref<1x256x128xbf16, #tpu.memory_space<vmem>>, vector<1x256x128xbf16>
    %170 = vector.shape_cast %169 : vector<1x256x128xbf16> to vector<256x128xbf16>
    %cst_93 = arith.constant dense<0.000000e+00> : vector<16x128xf32>
    %171 = tpu.matmul %168, %170, %cst_93 {dimension_numbers = #tpu.dot_dimension_numbers<[1], [0], [0], [1], [0, 0, 1, 1], [], []>} : vector<16x256xbf16>, vector<256x128xbf16>, vector<16x128xf32> -> vector<16x128xf32>
    %c0_94 = arith.constant 0 : index
    %c0_95 = arith.constant 0 : index
    %c0_96 = arith.constant 0 : index
    %172 = vector.load %arg16[%c0_94, %c0_95, %c0_96] : memref<1x1x128xf32, #tpu.memory_space<vmem>>, vector<1x1x128xf32>
    %173 = vector.shape_cast %172 : vector<1x1x128xf32> to vector<1x128xf32>
    %174 = vector.broadcast %173 : vector<1x128xf32> to vector<16x128xf32>
    %175 = arith.addf %171, %174 : vector<16x128xf32>
    %176 = arith.addf %125, %175 : vector<16x128xf32>
    %c0_97 = arith.constant 0 : index
    %c0_98 = arith.constant 0 : index
    %177 = vector.load %arg17[%c0_97, %c0_98] : memref<16x128xf32, #tpu.memory_space<vmem>>, vector<16x128xf32>
    tpu.vector_store %arg17[%c0_97, %c0_98], %176 {strides = array<i32>} : memref<16x128xf32, #tpu.memory_space<vmem>>, vector<16x128xf32>,
    return
  }
  func.func @transform_0(%arg0: i32) -> (i32, i32) {
    %c0_i32 = arith.constant 0 : i32
    %c0_i32_0 = arith.constant 0 : i32
    %c0_i32_1 = arith.constant 0 : i32
    return %c0_i32, %c0_i32_0 : i32, i32
  }
  func.func @transform_1(%arg0: i32) -> (i32, i32) {
    %c0_i32 = arith.constant 0 : i32
    %c0_i32_0 = arith.constant 0 : i32
    %c0_i32_1 = arith.constant 0 : i32
    return %c0_i32, %c0_i32_0 : i32, i32
  }
  func.func @transform_2(%arg0: i32) -> (i32, i32) {
    %c0_i32 = arith.constant 0 : i32
    %c0_i32_0 = arith.constant 0 : i32
    %c0_i32_1 = arith.constant 0 : i32
    return %c0_i32, %c0_i32_0 : i32, i32
  }
  func.func @transform_3(%arg0: i32) -> (i32, i32) {
    %c0_i32 = arith.constant 0 : i32
    %c0_i32_0 = arith.constant 0 : i32
    %c0_i32_1 = arith.constant 0 : i32
    return %c0_i32, %c0_i32_0 : i32, i32
  }
  func.func @transform_4(%arg0: i32) -> (i32, i32, i32) {
    %c0_i32 = arith.constant 0 : i32
    %c0_i32_0 = arith.constant 0 : i32
    %c0_i32_1 = arith.constant 0 : i32
    return %arg0, %c0_i32, %c0_i32_0 : i32, i32, i32
  }
  func.func @transform_5(%arg0: i32) -> (i32, i32, i32) {
    %c0_i32 = arith.constant 0 : i32
    %c0_i32_0 = arith.constant 0 : i32
    %c0_i32_1 = arith.constant 0 : i32
    return %arg0, %c0_i32, %c0_i32_0 : i32, i32, i32
  }
  func.func @transform_6(%arg0: i32) -> (i32, i32, i32) {
    %c0_i32 = arith.constant 0 : i32
    %c0_i32_0 = arith.constant 0 : i32
    %c0_i32_1 = arith.constant 0 : i32
    return %arg0, %c0_i32, %c0_i32_0 : i32, i32, i32
  }
  func.func @transform_7(%arg0: i32) -> (i32, i32, i32) {
    %c0_i32 = arith.constant 0 : i32
    %c0_i32_0 = arith.constant 0 : i32
    %c0_i32_1 = arith.constant 0 : i32
    return %arg0, %c0_i32, %c0_i32_0 : i32, i32, i32
  }
  func.func @transform_8(%arg0: i32) -> (i32, i32, i32) {
    %c0_i32 = arith.constant 0 : i32
    %c0_i32_0 = arith.constant 0 : i32
    %c0_i32_1 = arith.constant 0 : i32
    return %arg0, %c0_i32, %c0_i32_0 : i32, i32, i32
  }
  func.func @transform_9(%arg0: i32) -> (i32, i32, i32) {
    %c0_i32 = arith.constant 0 : i32
    %c0_i32_0 = arith.constant 0 : i32
    %c0_i32_1 = arith.constant 0 : i32
    return %arg0, %c0_i32, %c0_i32_0 : i32, i32, i32
  }
  func.func @transform_10(%arg0: i32) -> (i32, i32, i32) {
    %c0_i32 = arith.constant 0 : i32
    %c0_i32_0 = arith.constant 0 : i32
    %c0_i32_1 = arith.constant 0 : i32
    return %arg0, %c0_i32, %c0_i32_0 : i32, i32, i32
  }
  func.func @transform_11(%arg0: i32) -> (i32, i32, i32) {
    %c0_i32 = arith.constant 0 : i32
    %c0_i32_0 = arith.constant 0 : i32
    %c0_i32_1 = arith.constant 0 : i32
    return %arg0, %c0_i32, %c0_i32_0 : i32, i32, i32
  }
  func.func @transform_12(%arg0: i32) -> (i32, i32, i32) {
    %c0_i32 = arith.constant 0 : i32
    %c0_i32_0 = arith.constant 0 : i32
    %c0_i32_1 = arith.constant 0 : i32
    return %arg0, %c0_i32, %c0_i32_0 : i32, i32, i32
  }
  func.func @transform_13(%arg0: i32) -> (i32, i32, i32) {
    %c0_i32 = arith.constant 0 : i32
    %c0_i32_0 = arith.constant 0 : i32
    %c0_i32_1 = arith.constant 0 : i32
    return %arg0, %c0_i32, %c0_i32_0 : i32, i32, i32
  }
  func.func @transform_14(%arg0: i32) -> (i32, i32, i32) {
    %c0_i32 = arith.constant 0 : i32
    %c0_i32_0 = arith.constant 0 : i32
    %c0_i32_1 = arith.constant 0 : i32
    return %arg0, %c0_i32, %c0_i32_0 : i32, i32, i32
  }
  func.func @transform_15(%arg0: i32) -> (i32, i32, i32) {
    %c0_i32 = arith.constant 0 : i32
    %c0_i32_0 = arith.constant 0 : i32
    %c0_i32_1 = arith.constant 0 : i32
    return %arg0, %c0_i32, %c0_i32_0 : i32, i32, i32
  }
  func.func @transform_16(%arg0: i32) -> (i32, i32) {
    %c0_i32 = arith.constant 0 : i32
    %c0_i32_0 = arith.constant 0 : i32
    %c0_i32_1 = arith.constant 0 : i32
    return %c0_i32, %c0_i32_0 : i32, i32
  }
}

module attributes {stable_mosaic.version = 11 : i64} {
  func.func @_mlp_head_kernel(%arg0: memref<2x128xf32, #tpu.memory_space<vmem>>, %arg1: memref<1x128xf32, #tpu.memory_space<vmem>>, %arg2: memref<1x128xf32, #tpu.memory_space<vmem>>, %arg3: memref<128x256xbf16, #tpu.memory_space<vmem>>, %arg4: memref<1x256xf32, #tpu.memory_space<vmem>>, %arg5: memref<256x128xbf16, #tpu.memory_space<vmem>>, %arg6: memref<1x128xf32, #tpu.memory_space<vmem>>, %arg7: memref<2x128xf32, #tpu.memory_space<vmem>>) attributes {dimension_semantics = [], scalar_prefetch = 0 : i64, scratch_operands = 0 : i64, tpu.core_type = #tpu.core_type<tc>} {
    %c0 = arith.constant 0 : index
    %c0_0 = arith.constant 0 : index
    %0 = vector.load %arg0[%c0, %c0_0] : memref<2x128xf32, #tpu.memory_space<vmem>>, vector<2x128xf32>
    %c0_1 = arith.constant 0 : index
    %c0_2 = arith.constant 0 : index
    %1 = vector.load %arg1[%c0_1, %c0_2] : memref<1x128xf32, #tpu.memory_space<vmem>>, vector<1x128xf32>
    %c0_3 = arith.constant 0 : index
    %c0_4 = arith.constant 0 : index
    %2 = vector.load %arg2[%c0_3, %c0_4] : memref<1x128xf32, #tpu.memory_space<vmem>>, vector<1x128xf32>
    %cst = arith.constant dense<0.000000e+00> : vector<2xf32>
    %3 = vector.multi_reduction <add>, %0, %cst [1] : vector<2x128xf32> to vector<2xf32>
    %4 = vector.shape_cast %3 : vector<2xf32> to vector<2x1xf32>
    %cst_5 = arith.constant 1.280000e+02 : f32
    %5 = vector.broadcast %cst_5 : f32 to vector<2x1xf32>
    %6 = arith.divf %4, %5 : vector<2x1xf32>
    %7 = vector.broadcast %6 : vector<2x1xf32> to vector<2x128xf32>
    %8 = arith.subf %0, %7 : vector<2x128xf32>
    %9 = arith.mulf %8, %8 : vector<2x128xf32>
    %cst_6 = arith.constant dense<0.000000e+00> : vector<2xf32>
    %10 = vector.multi_reduction <add>, %9, %cst_6 [1] : vector<2x128xf32> to vector<2xf32>
    %11 = vector.shape_cast %10 : vector<2xf32> to vector<2x1xf32>
    %cst_7 = arith.constant 1.280000e+02 : f32
    %12 = vector.broadcast %cst_7 : f32 to vector<2x1xf32>
    %13 = arith.divf %11, %12 : vector<2x1xf32>
    %14 = vector.broadcast %6 : vector<2x1xf32> to vector<2x128xf32>
    %15 = arith.subf %0, %14 : vector<2x128xf32>
    %cst_8 = arith.constant 9.99999974E-6 : f32
    %16 = vector.broadcast %cst_8 : f32 to vector<2x1xf32>
    %17 = arith.addf %13, %16 : vector<2x1xf32>
    %18 = math.rsqrt %17 : vector<2x1xf32>
    %19 = vector.broadcast %18 : vector<2x1xf32> to vector<2x128xf32>
    %20 = arith.mulf %15, %19 : vector<2x128xf32>
    %21 = vector.broadcast %1 : vector<1x128xf32> to vector<2x128xf32>
    %22 = arith.mulf %20, %21 : vector<2x128xf32>
    %23 = vector.broadcast %2 : vector<1x128xf32> to vector<2x128xf32>
    %24 = arith.addf %22, %23 : vector<2x128xf32>
    %25 = arith.truncf %24 : vector<2x128xf32> to vector<2x128xbf16>
    %c0_9 = arith.constant 0 : index
    %c0_10 = arith.constant 0 : index
    %26 = vector.load %arg3[%c0_9, %c0_10] : memref<128x256xbf16, #tpu.memory_space<vmem>>, vector<128x256xbf16>
    %cst_11 = arith.constant dense<0.000000e+00> : vector<2x256xf32>
    %27 = tpu.matmul %25, %26, %cst_11 {dimension_numbers = #tpu.dot_dimension_numbers<[1], [0], [0], [1], [0, 0, 1, 1], [], []>} : vector<2x128xbf16>, vector<128x256xbf16>, vector<2x256xf32> -> vector<2x256xf32>
    %c0_12 = arith.constant 0 : index
    %c0_13 = arith.constant 0 : index
    %28 = vector.load %arg4[%c0_12, %c0_13] : memref<1x256xf32, #tpu.memory_space<vmem>>, vector<1x256xf32>
    %29 = vector.broadcast %28 : vector<1x256xf32> to vector<2x256xf32>
    %30 = arith.addf %27, %29 : vector<2x256xf32>
    %31 = arith.truncf %30 : vector<2x256xf32> to vector<2x256xbf16>
    %c0_14 = arith.constant 0 : index
    %c0_15 = arith.constant 0 : index
    %32 = vector.load %arg5[%c0_14, %c0_15] : memref<256x128xbf16, #tpu.memory_space<vmem>>, vector<256x128xbf16>
    %cst_16 = arith.constant dense<0.000000e+00> : vector<2x128xf32>
    %33 = tpu.matmul %31, %32, %cst_16 {dimension_numbers = #tpu.dot_dimension_numbers<[1], [0], [0], [1], [0, 0, 1, 1], [], []>} : vector<2x256xbf16>, vector<256x128xbf16>, vector<2x128xf32> -> vector<2x128xf32>
    %c0_17 = arith.constant 0 : index
    %c0_18 = arith.constant 0 : index
    %34 = vector.load %arg6[%c0_17, %c0_18] : memref<1x128xf32, #tpu.memory_space<vmem>>, vector<1x128xf32>
    %35 = vector.broadcast %34 : vector<1x128xf32> to vector<2x128xf32>
    %36 = arith.addf %33, %35 : vector<2x128xf32>
    %c0_19 = arith.constant 0 : index
    %c0_20 = arith.constant 0 : index
    %37 = vector.load %arg7[%c0_19, %c0_20] : memref<2x128xf32, #tpu.memory_space<vmem>>, vector<2x128xf32>
    tpu.vector_store %arg7[%c0_19, %c0_20], %36 {strides = array<i32>} : memref<2x128xf32, #tpu.memory_space<vmem>>, vector<2x128xf32>,
    return
  }
}

</mosaic_0001>

<bundles_post_ra>
// kernel: _lambda_.4
= control target key start
LH: loop header
LB: loop body
LE: loop exit
PB: predicated region body
PF: predicated region fallthrough
CT: control target
= control target key end

     0   :  { %s3162_s21 = smov 0   ;;  %s3559_s0 = inlined_call_operand.vmem [shape: f32[16,128], index: 0, kind: input, shape index: {}]   ;;  %s3560_s1 = inlined_call_operand.vmem [shape: f32[16,16], index: 1, kind: input, shape index: {}]   ;;  %s3561_s2 = inlined_call_operand.vmem [shape: f32[1,128], index: 2, kind: input, shape index: {}]   ;;  %s3562_s3 = inlined_call_operand.vmem [shape: f32[1,128], index: 3, kind: input, shape index: {}]   ;;  %s3563_s4 = inlined_call_operand.vmem [shape: f32[2,1,128], index: 4, kind: input, shape index: {}]   ;;  %s3564_s5 = inlined_call_operand.vmem [shape: f32[2,1,128], index: 5, kind: input, shape index: {}]   ;;  %s3565_s6 = inlined_call_operand.vmem [shape: bf16[2,128,384], index: 6, kind: input, shape index: {}]   ;;  %s3566_s7 = inlined_call_operand.vmem [shape: f32[2,1,384], index: 7, kind: input, shape index: {}]   ;;  %s3567_s8 = inlined_call_operand.vmem [shape: bf16[2,128,128], index: 8, kind: input, shape index: {}]   ;;  %s3568_s9 = inlined_call_operand.vmem [shape: f32[2,1,128], index: 9, kind: input, shape index: {}]   ;;  %s3569_s10 = inlined_call_operand.vmem [shape: f32[2,1,128], index: 10, kind: input, shape index: {}]   ;;  %s3570_s11 = inlined_call_operand.vmem [shape: f32[2,1,128], index: 11, kind: input, shape index: {}]   ;;  %s3571_s12 = inlined_call_operand.vmem [shape: bf16[2,128,256], index: 12, kind: input, shape index: {}]   ;;  %s3572_s13 = inlined_call_operand.vmem [shape: f32[2,1,256], index: 13, kind: input, shape index: {}]   ;;  %s3573_s14 = inlined_call_operand.vmem [shape: bf16[2,256,128], index: 14, kind: input, shape index: {}]   ;;  %s3574_s15 = inlined_call_operand.vmem [shape: f32[2,1,128], index: 15, kind: input, shape index: {}]   ;;  %s3575_s16 = inlined_call_operand.vmem [shape: f32[16,128], index: 16, kind: output, shape index: {}]  }
   0x1   :  { %3581 = sst [smem:[#allocation5_spill]] %s3559_s0 }
   0x2   :  { %3582 = sst [smem:[#allocation6_spill]] %s3560_s1 }
   0x3   :  { %3583 = sst [smem:[#allocation7_spill]] %s3563_s4 }
   0x4   :  { %3584 = sst [smem:[#allocation8_spill]] %s3564_s5 }
   0x5   :  { %3585 = sst [smem:[#allocation9_spill]] %s3565_s6 }
   0x6   :  { %3586 = sst [smem:[#allocation10_spill]] %s3567_s8 }
   0x7   :  { %3587 = sst [smem:[#allocation11_spill]] %s3575_s16 }
   0x8 LB: > { %3588 = sst [smem:[#allocation4_spill]] %s3069_s21  ;;  %s2563_s22 = sadd.s32 4294967295, %s3069_s21   ;;  %s3069_s21 = sphi %s3162_s21, %s26_s21  }
   0x9   : > { %p2566_p0 = scmp.ge.s32.totalorder %s3069_s21, 1  ;;  %p553_p1 = scmp.lt.s32.totalorder %s3069_s21, 3 }
   0xb   : > { %p554_p2 = pnand %p2566_p0, %p553_p1 }
   0xc   : > { %p639_p3 = scmp.lt.s32.totalorder (!%p554_p2), %s2563_s22, 1  ;;  %s3591_s8 = sld [smem:[#allocation10_spill]] (!%p554_p2) }
   0xd   : > { %557 = sbr.rel (%p554_p2) target bundleno = 3981 (0xf8d), region = 84  ;;  %s3592_s6 = sld [smem:[#allocation9_spill]] (!%p554_p2) }
   0xe   : > { %p2575_p4 = scmp.ne.s32.totalorder (!%p554_p2), %s2563_s22, 0 }
  0x14   : > { %s3170_s23 = scalar_select %p639_p3, %s2563_s22, 1 }
  0x15   : > { %689 = sbr.rel (%p2575_p4) target bundleno = 351 (0x15f), region = 88  ;;  %v2576_v17 = vld [vmem:[%s3561_s2] ss:$0 sm:$0xff] (!%p2575_p4)  ;;  %s3594_s28 = sld [smem:[#allocation11_spill]] (!%p2575_p4) }
  0x16   : > { %s2885_s30 = smul.u32 192, %s3170_s23  ;;  %s2674_s0 = sshll.u32 %s3170_s23, 6  ;;  %v2577_v19 = vld [vmem:[%s3562_s3] ss:$0 sm:$0xff] (!%p2575_p4) }
  0x17   : > { %s2886_s17 = smul.u32 3, %s3170_s23  ;;  %s3186_s20 = scalar_lea.vmem %s3591_s8, %s2674_s0 }
  0x18   : > { %s3191_s21 = scalar_lea.vmem %s3592_s6, %s2885_s30  ;;  %s2675_s24 = sshll.u32 %s3170_s23, 7 }
  0x19   : > { %s3200_s29 = scalar_lea.vmem %s3566_s7, %s2886_s17  ;;  %s3214_s6 = scalar_lea.vmem %s3571_s12, %s2675_s24 }
  0x1a   : > { %s2572_s1 = sshll.u32 %s3170_s23, 1  ;;  %s3225_s5 = scalar_lea.vmem %s3573_s14, %s2675_s24 }
  0x1b   : > { %s3220_s17 = scalar_lea.vmem %s3572_s13, %s2572_s1  ;;  %s684_s19 = scalar_lea.vmem %s3574_s15, %s3170_s23 }
  0x1c   : > { %s3593_s8 = sld [smem:[#allocation5_spill]] }
  0x22   : > { %v690_v0 = vld [vmem:[%s3593_s8] sm:$0xff]  ;;  %v691_v1 = vld [vmem:[%s3593_s8 + $0x8] sm:$0xff] }
  0x23   : > { %694 = vadd.xlane.f32.xlu0 %v690_v0 }
  0x27   : > { %696 = vadd.xlane.f32.xlu0 %v691_v1 }
  0xb0   : > { %v695_v2 = vpop.xlane.xlu0 %694 }
  0xb1   : > { %v699_v3 = vmul.f32 0.0078125, %v695_v2 }
  0xb3   : > { %v701_v4 = vsub.f32 %v690_v0, %v699_v3 }
  0xb4   : > { %v697_v5 = vpop.xlane.xlu0 %696 }
  0xb5   : > { %v700_v6 = vmul.f32 0.0078125, %v697_v5  ;;  %v703_v7 = vmul.f32 %v701_v4, %v701_v4 }
  0xb7   : > { %v702_v8 = vsub.f32 %v691_v1, %v700_v6  ;;  %705 = vadd.xlane.f32.xlu1 %v703_v7 }
  0xb9   : > { %v704_v9 = vmul.f32 %v702_v8, %v702_v8 }
  0xbb   : > { %707 = vadd.xlane.f32.xlu1 %v704_v9 }
 0x144   : > { %v706_v10 = vpop.xlane.xlu1 %705 }
 0x145   : > { %v709_v11 = vmul.f32 0.0078125, %v706_v10 }
 0x147   : > { %v711_v12 = vadd.f32 1e-05, %v709_v11 }
 0x148   : > { %v708_v13 = vpop.xlane.xlu1 %707 }
 0x149   : > { %2901 = vrsqrt.f32 %v711_v12  ;;  %v710_v14 = vmul.f32 0.0078125, %v708_v13 }
 0x14b   : > { %v712_v15 = vadd.f32 1e-05, %v710_v14 }
 0x14d   : > { %2903 = vrsqrt.f32 %v712_v15 }
 0x153   : > { %v2902_v16 = vpop.eup %2901 }
 0x154   : > { %v715_v18 = vmul.f32 %v2902_v16, %v701_v4 }
 0x156   : > { %v723_v20 = vmul.f32 %v2576_v17, %v715_v18 }
 0x157   : > { %v2904_v21 = vpop.eup %2903 }
 0x158   : > { %v731_v22 = vadd.f32 %v2577_v19, %v723_v20  ;;  %v716_v23 = vmul.f32 %v2904_v21, %v702_v8 }
 0x15a   : > { %733 = vst [vmem:[%s3594_s28] sm:$0xff] %v731_v22  ;;  %v724_v24 = vmul.f32 %v2576_v17, %v716_v23 }
 0x15c   : > { %v732_v25 = vadd.f32 %v2577_v19, %v724_v24 }
 0x15e   : > { %734 = vst [vmem:[%s3594_s28 + $0x8] sm:$0xff] %v732_v25 }
 0x15f PF: > { %s3595_s4 = sld [smem:[#allocation11_spill]]  ;;  %v2935_v28 = vld [vmem:[%s3191_s21 + $0x4] ss:$12 sps:$4 sm:$0xff]   ;;  %v2937_v29 = vld [vmem:[%s3191_s21] ss:$12 sps:$4 sm:$0xff]   ;;  %v3071_v30 = vmov 0.0   ;;  %v815_v15 = vlaneseq  ;;  %s3603_s27 = scalar_lea.vmem %s3568_s9, %s3170_s23 }
 0x160   : > { %2749 = vmatprep.subr.bf16.mxu1 %v3071_v30  ;;  %v2938_v31 = vld [vmem:[%s3191_s21 + $0x8] ss:$12 sps:$4 sm:$0xff]   ;;  %958 = vmatprep.subr.bf16.mxu0 %v2935_v28  ;;  %v2941_v41 = vld [vmem:[%s3191_s21 + $0x18] ss:$12 sps:$4 sm:$0xff]   ;;  %v2942_v42 = vld [vmem:[%s3191_s21 + $0x20] ss:$12 sps:$4 sm:$0xff]   ;;  %s3605_s30 = scalar_lea.vmem %s3570_s11, %s3170_s23 }
 0x161   : > { %v2939_v32 = vld [vmem:[%s3191_s21 + $0x1c] ss:$12 sps:$4 sm:$0xff]   ;;  %959 = vmatpush1.bf16.msra.mxu0 %v2937_v29  ;;  %2750 = vmatpush3.bf16.msra.mxu1 %v2938_v31  ;;  %v2943_v43 = vld [vmem:[%s3191_s21 + $0x34] ss:$12 sps:$4 sm:$0xff]   ;;  %v2946_v45 = vld [vmem:[%s3191_s21 + $0x38] ss:$12 sps:$4 sm:$0xff]  }
 0x162   : > { %960 = vmatprep.subr.bf16.mxu0 %v2939_v32  ;;  %2751 = vmatprep.subr.bf16.mxu1 %v3071_v30  ;;  %v2945_v44 = vld [vmem:[%s3191_s21 + $0x30] ss:$12 sps:$4 sm:$0xff]   ;;  %v2947_v46 = vld [vmem:[%s3191_s21 + $0x4c] ss:$12 sps:$4 sm:$0xff]   ;;  %v2949_v47 = vld [vmem:[%s3191_s21 + $0x48] ss:$12 sps:$4 sm:$0xff]  }
 0x163   : > { %v2950_v48 = vld [vmem:[%s3191_s21 + $0x50] ss:$12 sps:$4 sm:$0xff]   ;;  %v2953_v50 = vld [vmem:[%s3191_s21 + $0x60] ss:$12 sps:$4 sm:$0xff]   ;;  %v2954_v51 = vld [vmem:[%s3191_s21 + $0x68] ss:$12 sps:$4 sm:$0xff]  }
 0x164   : > { %v2951_v49 = vld [vmem:[%s3191_s21 + $0x64] ss:$12 sps:$4 sm:$0xff]   ;;  %v2955_v52 = vld [vmem:[%s3191_s21 + $0x7c] ss:$12 sps:$4 sm:$0xff]   ;;  %v2958_v54 = vld [vmem:[%s3191_s21 + $0x80] ss:$12 sps:$4 sm:$0xff]  }
 0x165   : > { %v3252_v26 = vld [vmem:[%s3595_s4] sm:$0xff]  ;;  %v3257_v27 = vld [vmem:[%s3595_s4 + $0x8] sm:$0xff]  ;;  %961 = vmatpush1.bf16.msra.mxu0 %v2941_v41  ;;  %2752 = vmatpush3.bf16.msra.mxu1 %v2942_v42  ;;  %v3072_v56 = vmov 0   ;;  %vm3073_vm0 = vmmov 0   ;;  %v2961_v57 = vld [vmem:[%s3191_s21 + $0x90] ss:$12 sps:$4 sm:$0xff]  }
 0x166   : > { %741 = vadd.xlane.f32.xlu0 %v3252_v26  ;;  %2753 = vmatprep.subr.bf16.mxu1 %v3071_v30  ;;  %v2957_v53 = vld [vmem:[%s3191_s21 + $0x78] ss:$12 sps:$4 sm:$0xff]   ;;  %v2959_v55 = vld [vmem:[%s3191_s21 + $0x94] ss:$12 sps:$4 sm:$0xff]   ;;  %v2966_v61 = vld [vmem:[%s3191_s21 + $0xb0] ss:$12 sps:$4 sm:$0xff]  }
 0x167   : > { %962 = vmatprep.subr.bf16.mxu0 %v2943_v43  ;;  %990 = vmatprep.mubr.bf16.mxu0 %v3072_v56  ;;  %v2962_v58 = vld [vmem:[%s3191_s21 + $0x98] ss:$12 sps:$4 sm:$0xff]   ;;  %v2965_v60 = vld [vmem:[%s3191_s21 + $0xa8] ss:$12 sps:$4 sm:$0xff]   ;;  %s3596_s1 = sld [smem:[#allocation7_spill]]  ;;  %s3598_s16 = sld [smem:[#allocation8_spill]] }
 0x168   : > { %2765 = vmatprep.mubr.msk.bf16.mxu1 %vm3073_vm0, %v3071_v30  ;;  %v2963_v59 = vld [vmem:[%s3191_s21 + $0xac] ss:$12 sps:$4 sm:$0xff]   ;;  %v3318_v16 = vshrl.u32 %v815_v15, 7  ;;  %v813_v18 = vld [vmem:[%s3200_s29] sm:$0x7]  ;;  %vm1054_vm1 = vcmask 261120  }
 0x169   : > { %963 = vmatpush1.bf16.msra.mxu0 %v2945_v44  ;;  %2754 = vmatpush3.bf16.msra.mxu1 %v2946_v45  ;;  %vm3334_vm2 = vmpackc.low %vm1054_vm1, %vm1054_vm1  ;;  %s3602_s25 = sld [smem:[#allocation6_spill]]  ;;  %vm1146_vm3 = vcmask 130048   ;;  %s3074_s24 = smov 64   ;;  %vm1466_vm4 = vcmask 523264   ;;  %vm1907_vm5 = vcmask 1048064  }
 0x16a   : > { %743 = vadd.xlane.f32.xlu0 %v3257_v27  ;;  %2755 = vmatprep.subr.bf16.mxu1 %v3071_v30  ;;  %v817_v17 = vsub.s32 0, %v3318_v16  ;;  %v825_v19 = vsub.s32 2, %v3318_v16  ;;  %v821_v20 = vsub.s32 1, %v3318_v16  ;;  %s3075_s21 = smov 96  }
 0x16b   : > { %964 = vmatprep.subr.bf16.mxu0 %v2947_v46 }
 0x16c   : > { %v818_v21 = vrot.slane %v813_v18, %v817_v17  ;;  %v826_v22 = vrot.slane %v813_v18, %v825_v19  ;;  %v822_v25 = vrot.slane %v813_v18, %v821_v20 }
 0x16d   : > { %965 = vmatpush1.bf16.msra.mxu0 %v2949_v47  ;;  %2756 = vmatpush3.bf16.msra.mxu1 %v2950_v48  ;;  %s3597_s26 = scalar_lea.vmem %s3596_s1, %s3170_s23  ;;  %s3599_s0 = scalar_lea.vmem %s3598_s16, %s3170_s23 }
 0x16e   : > { %2757 = vmatprep.subr.bf16.mxu1 %v3071_v30  ;;  %966 = vmatprep.subr.bf16.mxu0 %v2951_v49  ;;  %v2578_v6 = vld [vmem:[%s3597_s26] ss:$0 sm:$0xff]  ;;  %s3076_s1 = smov 32   ;;  %s3604_s16 = scalar_lea.vmem %s3569_s10, %s3170_s23 }
 0x16f   : > { %v2579_v10 = vld [vmem:[%s3599_s0] ss:$0 sm:$0xff]  ;;  %v3353_v47 = vld [vmem:[%s3602_s25 + $0x8] sm:$0xff] }
 0x171   : > { %967 = vmatpush1.bf16.msra.mxu0 %v2953_v50  ;;  %2758 = vmatpush3.bf16.msra.mxu1 %v2954_v51  ;;  %v3358_v50 = vld [vmem:[%s3602_s25] sm:$0xff] }
 0x172   : > { %968 = vmatprep.subr.bf16.mxu0 %v2955_v52  ;;  %2759 = vmatprep.subr.bf16.mxu1 %v3071_v30 }
 0x175   : > { %969 = vmatpush1.bf16.msra.mxu0 %v2957_v53  ;;  %2760 = vmatpush3.bf16.msra.mxu1 %v2958_v54 }
 0x176   : > { %970 = vmatprep.subr.bf16.mxu0 %v2959_v55  ;;  %2761 = vmatprep.subr.bf16.mxu1 %v3071_v30 }
 0x179   : > { %971 = vmatpush1.bf16.msra.mxu0 %v2961_v57  ;;  %2762 = vmatpush3.bf16.msra.mxu1 %v2962_v58 }
 0x17a   : > { %972 = vmatprep.subr.bf16.mxu0 %v2963_v59  ;;  %2763 = vmatprep.subr.bf16.mxu1 %v3071_v30 }
 0x17d   : > { %973 = vmatpush1.bf16.msra.mxu0 %v2965_v60  ;;  %2764 = vmatpush3.bf16.msra.mxu1 %v2966_v61 }
 0x1f3   : > { %v742_v33 = vpop.xlane.xlu0 %741 }
 0x1f4   : > { %v746_v34 = vmul.f32 0.0078125, %v742_v33 }
 0x1f6   : > { %v3268_v35 = vsub.f32 %v3252_v26, %v746_v34 }
 0x1f7   : > { %v744_v36 = vpop.xlane.xlu0 %743 }
 0x1f8   : > { %v747_v37 = vmul.f32 0.0078125, %v744_v36  ;;  %v750_v38 = vmul.f32 %v3268_v35, %v3268_v35 }
 0x1fa   : > { %v3273_v39 = vsub.f32 %v3257_v27, %v747_v37  ;;  %752 = vadd.xlane.f32.xlu1 %v750_v38 }
 0x1fc   : > { %v751_v40 = vmul.f32 %v3273_v39, %v3273_v39 }
 0x1fe   : > { %754 = vadd.xlane.f32.xlu1 %v751_v40 }
 0x287   : > { %v753_v62 = vpop.xlane.xlu1 %752 }
 0x288   : > { %v756_v63 = vmul.f32 0.0078125, %v753_v62 }
 0x28a   : > { %v758_v0 = vadd.f32 1e-05, %v756_v63 }
 0x28b   : > { %v755_v1 = vpop.xlane.xlu1 %754 }
 0x28c   : > { %3015 = vrsqrt.f32 %v758_v0  ;;  %v757_v2 = vmul.f32 0.0078125, %v755_v1 }
 0x28e   : > { %v759_v3 = vadd.f32 1e-05, %v757_v2 }
 0x290   : > { %3017 = vrsqrt.f32 %v759_v3 }
 0x296   : > { %v3016_v4 = vpop.eup %3015 }
 0x297   : > { %v762_v5 = vmul.f32 %v3016_v4, %v3268_v35 }
 0x299   : > { %v770_v9 = vmul.f32 %v2578_v6, %v762_v5 }
 0x29a   : > { %v3018_v7 = vpop.eup %3017 }
 0x29b   : > { %v763_v8 = vmul.f32 %v3018_v7, %v3273_v39  ;;  %v778_v12 = vadd.f32 %v2579_v10, %v770_v9 }
 0x29d   : > { %v771_v11 = vmul.f32 %v2578_v6, %v763_v8 }
 0x29f   : > { %v779_v13 = vadd.f32 %v2579_v10, %v771_v11 }
 0x2a1   : > { %v780_v14 = vpack.c.bf16 %v779_v13, %v778_v12 }
 0x2a3   : > { %991 = vmatmul.mubr.bf16.vlgmr.msra.gmra.mrb[0].mxu0 %v780_v14  ;;  %2766 = vmatmul.mubr.bf16.vlgmr.msra.gmra.mrb[0].mxu1 %v780_v14 }
 0x376   : > { %v992_v23 = vpop.f32.mrb[0].mxu0  ;;  %v1035_v24 = vpop.f32.mrb[0].mxu1 }
 0x377   : > { %v3328_v28 = vadd.f32 %v992_v23, %v818_v21  ;;  %v994_v29 = vpop.f32.mrb[1].mxu0  ;;  %v2767_v31 = vpop.f32.mrb[1].mxu1  ;;  %v1036_v34 = vadd.f32 %v1035_v24, %v826_v22 }
 0x378   : > { %v996_v32 = vpop.f32.mrb[2].mxu0  ;;  %v1038_v33 = vpop.f32.mrb[2].mxu1  ;;  %v995_v38 = vadd.f32 %v994_v29, %v822_v25 }
 0x379   : > { %v1039_v35 = vadd.f32 %v1038_v33, %v826_v22  ;;  %v998_v36 = vpop.f32.mrb[3].mxu0  ;;  %v2768_v37 = vpop.f32.mrb[3].mxu1  ;;  %2773 = vmatprep.mubr.msk.f32.mxu0 %vm1054_vm1, %v3328_v28  ;;  %v3346_v45 = vadd.f32 %v996_v32, %v818_v21 }
 0x37a   : > { %v999_v39 = vadd.f32 %v998_v36, %v822_v25 }
 0x37b   : > { %v2851_v41 = vpack.c.bf16 %v1039_v35, %v1036_v34  ;;  %v3338_v42 = vpack.i.bf16 %v1039_v35, %v1036_v34 }
 0x37c   : > { %v2845_v43 = vpack.c.bf16 %v999_v39, %v995_v38  ;;  %v3340_v44 = vpack.i.bf16 %v999_v39, %v995_v38 }
 0x37e   : > { %2847 = vmatprep.subr.msk.bf16.mxu0 %vm3334_vm2, %v2845_v43 }
 0x37f   : > { %2850 = vmatpush3.bf16.xpose.msk.msra.mxu0 %vm3334_vm2, %v2845_v43 }
 0x380   : > { %2852 = vmatprep.subr.bf16.mxu0 %v2851_v41 }
 0x386   : > { %2774 = vmatmul.mubr.msk.f32.vlgmr.msra.gmra.mrb[4].mxu0 %vm1054_vm1, %v3346_v45 }
 0x387   : > { %2854 = vmatpush3.bf16.msra.mxu0 %v2851_v41 }
 0x459   : > { %v2775_v46 = vpop.f32.mrb[4].mxu0 }
 0x45a   : > { %v1143_v48 = vmul.f32 0.17677669, %v2775_v46  ;;  %v1133_v49 = vpop.f32.mrb[5].mxu0 }
 0x45b   : > { %v1142_v51 = vmul.f32 0.17677669, %v1133_v49 }
 0x45c   : > { %v1145_v52 = vadd.f32 %v1143_v48, %v3353_v47 }
 0x45d   : > { %v1144_v53 = vadd.f32 %v1142_v51, %v3358_v50 }
 0x45e   : > { %v1150_v54 = vsel %vm1146_vm3, %v1145_v52, -inf }
 0x45f   : > { %1151 = vmax.xlane.f32.xlu1 %v1150_v54  ;;  %v1147_v55 = vsel %vm1146_vm3, %v1144_v53, -inf }
 0x460   : > { %1148 = vmax.xlane.f32.xlu0 %v1147_v55 }
 0x4ec   : > { %v1152_v57 = vpop.xlane.xlu1 %1151 }
 0x4ed   : > { %v1154_v58 = vsub.f32 %v1145_v52, %v1152_v57  ;;  %v1149_v59 = vpop.xlane.xlu0 %1148 }
 0x4ee   : > { %v1153_v60 = vsub.f32 %v1144_v53, %v1149_v59 }
 0x4ef   : > { %v1157_v61 = vmul.f32 1.442695, %v1154_v58 }
 0x4f0   : > { %v1155_v62 = vmul.f32 1.442695, %v1153_v60 }
 0x4f1   : > { %3019 = vpow2.f32 %v1157_v61 }
 0x4f2   : > { %3021 = vpow2.f32 %v1155_v62 }
 0x4fb   : > { %v3020_v63 = vpop.eup %3019 }
 0x4fc   : > { %v3022_v0 = vpop.eup %3021  ;;  %v1162_v1 = vsel %vm1146_vm3, %v3020_v63, 0.0 }
 0x4fd   : > { %1163 = vadd.xlane.f32.xlu1 %v1162_v1  ;;  %v1159_v2 = vsel %vm1146_vm3, %v3022_v0, 0.0 }
 0x4fe   : > { %1160 = vadd.xlane.f32.xlu0 %v1159_v2 }
 0x50e   : > { %2911 = vrot.lane.b32.xlu1 %v3340_v44, %s3074_s24 }
 0x512   : > { %1250 = vrot.lane.b32.xlu1 %v3328_v28, %s3075_s21 }
 0x514   : > { %2906 = vrot.lane.b32.xlu0 %v3340_v44, %s3075_s21 }
 0x516   : > { %1252 = vrot.lane.b32.xlu1 %v3346_v45, %s3075_s21 }
 0x518   : > { %1477 = vrot.lane.b32.xlu0 %v3328_v28, %s3074_s24 }
 0x51a   : > { %1479 = vrot.lane.b32.xlu1 %v3346_v45, %s3074_s24 }
 0x58a   : > { %v1164_v3 = vpop.xlane.xlu1 %1163 }
 0x58b   : > { %3023 = vrcp.f32 %v1164_v3  ;;  %v1161_v4 = vpop.xlane.xlu0 %1160 }
 0x58c   : > { %3025 = vrcp.f32 %v1161_v4 }
 0x58e   : > { %v2912_v9 = vpop.permute.xlu1 %2911 }
 0x58f   : > { %v2907_v5 = vpop.permute.xlu0 %2906  ;;  %v2914_v12 = vunpack.i.h.bf16 %v2912_v9  ;;  %v2913_v13 = vunpack.i.l.bf16 %v2912_v9 }
 0x590   : > { %v2909_v6 = vunpack.i.h.bf16 %v2907_v5  ;;  %v2908_v7 = vunpack.i.l.bf16 %v2907_v5 }
 0x591   : > { %v2865_v18 = vpack.c.bf16 %v2914_v12, %v2913_v13 }
 0x592   : > { %v2855_v8 = vpack.c.bf16 %v2909_v6, %v2908_v7  ;;  %v1251_v19 = vpop.permute.xlu1 %1250 }
 0x593   : > { %v1478_v22 = vpop.permute.xlu0 %1477 }
 0x594   : > { %2857 = vmatprep.subr.msk.bf16.mxu0 %vm3334_vm2, %v2855_v8 }
 0x595   : > { %v3024_v10 = vpop.eup %3023 }
 0x596   : > { %v3026_v11 = vpop.eup %3025  ;;  %v1168_v15 = vmul.f32 %v3024_v10, %v3020_v63  ;;  %v1253_v21 = vpop.permute.xlu1 %1252 }
 0x597   : > { %v1167_v14 = vmul.f32 %v3026_v11, %v3022_v0 }
 0x599   : > { %2780 = vmatprep.mubr.msk.f32.mxu0 %vm1146_vm3, %v1167_v14 }
 0x59a   : > { %2781 = vmatmul.mubr.msk.f32.vlgmr.msra.gmra.mrb[6].mxu0 %vm1146_vm3, %v1168_v15  ;;  %v1480_v23 = vpop.permute.xlu1 %1479 }
 0x59b   : > { %2860 = vmatpush3.bf16.xpose.msk.msra.mxu0 %vm3334_vm2, %v2855_v8  ;;  %2787 = vmatprep.mubr.msk.f32.mxu0 %vm1054_vm1, %v1251_v19 }
 0x59c   : > { %2867 = vmatprep.subr.msk.bf16.mxu0 %vm3334_vm2, %v2865_v18 }
 0x5a2   : > { %2788 = vmatmul.mubr.msk.f32.vlgmr.msra.gmra.mrb[8].mxu0 %vm1054_vm1, %v1253_v21 }
 0x5a3   : > { %2870 = vmatpush3.bf16.xpose.msk.msra.mxu0 %vm3334_vm2, %v2865_v18  ;;  %2801 = vmatprep.mubr.msk.f32.mxu0 %vm1054_vm1, %v1478_v22 }
 0x5aa   : > { %2802 = vmatmul.mubr.msk.f32.vlgmr.msra.gmra.mrb[10].mxu0 %vm1054_vm1, %v1480_v23 }
 0x66d   : > { %v3392_v24 = vpop.f32.mrb[6].mxu0 }
 0x66e   : > { %v3394_v25 = vpop.f32.mrb[7].mxu0 }
 0x675   : > { %v2789_v29 = vpop.f32.mrb[8].mxu0 }
 0x676   : > { %v1332_v31 = vpop.f32.mrb[9].mxu0  ;;  %v1342_v41 = vmul.f32 0.17677669, %v2789_v29 }
 0x677   : > { %v1341_v63 = vmul.f32 0.17677669, %v1332_v31 }
 0x678   : > { %v1344_v43 = vadd.f32 %v1342_v41, %v3353_v47 }
 0x679   : > { %v1343_v0 = vadd.f32 %v1341_v63, %v3358_v50 }
 0x67a   : > { %v1348_v46 = vsel %vm1146_vm3, %v1344_v43, -inf }
 0x67b   : > { %v1345_v1 = vsel %vm1146_vm3, %v1343_v0, -inf }
 0x67d   : > { %v2803_v32 = vpop.f32.mrb[10].mxu0 }
 0x67e   : > { %v1571_v33 = vmul.f32 0.17677669, %v2803_v32  ;;  %v1561_v34 = vpop.f32.mrb[11].mxu0 }
 0x67f   : > { %v1570_v35 = vmul.f32 0.17677669, %v1561_v34 }
 0x680   : > { %v1573_v36 = vadd.f32 %v1571_v33, %v3353_v47 }
 0x681   : > { %v1572_v37 = vadd.f32 %v1570_v35, %v3358_v50 }
 0x682   : > { %v1577_v38 = vsel %vm1146_vm3, %v1573_v36, -inf }
 0x683   : > { %1578 = vmax.xlane.f32.xlu1 %v1577_v38  ;;  %v1574_v39 = vsel %vm1146_vm3, %v1572_v37, -inf }
 0x684   : > { %1575 = vmax.xlane.f32.xlu0 %v1574_v39 }
 0x694   : > { %2921 = vrot.lane.b32.xlu1 %v3340_v44, %s3076_s1 }
 0x698   : > { %1685 = vrot.lane.b32.xlu1 %v3328_v28, %s3076_s1 }
 0x69c   : > { %1687 = vrot.lane.b32.xlu1 %v3346_v45, %s3076_s1 }
 0x6c0   : > { %1349 = vmax.xlane.f32.xlu1 %v1348_v46 }
 0x710   : > { %v1579_v48 = vpop.xlane.xlu1 %1578 }
 0x711   : > { %v1581_v49 = vsub.f32 %v1573_v36, %v1579_v48  ;;  %v1576_v51 = vpop.xlane.xlu0 %1575 }
 0x712   : > { %v1580_v52 = vsub.f32 %v1572_v37, %v1576_v51 }
 0x713   : > { %v1584_v53 = vmul.f32 1.442695, %v1581_v49 }
 0x714   : > { %v1582_v54 = vmul.f32 1.442695, %v1580_v52  ;;  %v2922_v57 = vpop.permute.xlu1 %2921 }
 0x715   : > { %3027 = vpow2.f32 %v1584_v53  ;;  %v2924_v7 = vunpack.i.h.bf16 %v2922_v57  ;;  %v2923_v8 = vunpack.i.l.bf16 %v2922_v57 }
 0x716   : > { %3029 = vpow2.f32 %v1582_v54 }
 0x717   : > { %v2875_v12 = vpack.c.bf16 %v2924_v7, %v2923_v8  ;;  %v2967_v8 = vld [vmem:[%s3186_s20] sm:$0xff]  }
 0x718   : > { %v1686_v58 = vpop.permute.xlu1 %1685 }
 0x71c   : > { %v1688_v59 = vpop.permute.xlu1 %1687 }
 0x71f   : > { %v3028_v44 = vpop.eup %3027 }
 0x720   : > { %v1589_v28 = vsel %vm1146_vm3, %v3028_v44, 0.0  ;;  %v3030_v55 = vpop.eup %3029 }
 0x721   : > { %1590 = vadd.xlane.f32.xlu0 %v1589_v28  ;;  %v1586_v45 = vsel %vm1146_vm3, %v3030_v55, 0.0 }
 0x725   : > { %1587 = vadd.xlane.f32.xlu0 %v1586_v45 }
 0x73b   : > { %2916 = vrot.lane.b32.xlu0 %v3338_v42, %s3074_s24 }
 0x74d   : > { %v1350_v60 = vpop.xlane.xlu1 %1349 }
 0x74e   : > { %v1352_v61 = vsub.f32 %v1344_v43, %v1350_v60 }
 0x750   : > { %v1355_v62 = vmul.f32 1.442695, %v1352_v61 }
 0x752   : > { %3031 = vpow2.f32 %v1355_v62 }
 0x75a   : > { %1346 = vmax.xlane.f32.xlu0 %v1345_v1 }
 0x75c   : > { %v3414_v2 = vpop.eup %3031 }
 0x75d   : > { %v1360_v3 = vsel %vm1146_vm3, %v3414_v2, 0.0 }
 0x75e   : > { %1361 = vadd.xlane.f32.xlu1 %v1360_v3 }
 0x7ae   : > { %v1591_v4 = vpop.xlane.xlu0 %1590 }
 0x7af   : > { %3033 = vrcp.f32 %v1591_v4 }
 0x7b2   : > { %v1588_v5 = vpop.xlane.xlu0 %1587 }
 0x7b3   : > { %3035 = vrcp.f32 %v1588_v5 }
 0x7b6   : > { %v2917_v6 = vpop.permute.xlu0 %2916 }
 0x7b7   : > { %v2919_v9 = vunpack.i.h.bf16 %v2917_v6  ;;  %v2918_v10 = vunpack.i.l.bf16 %v2917_v6 }
 0x7b9   : > { %v2871_v11 = vpack.c.bf16 %v2919_v9, %v2918_v10  ;;  %v3034_v13 = vpop.eup %3033  ;;  %v2968_v10 = vld [vmem:[%s3186_s20 + $0x8] sm:$0xff]  }
 0x7ba   : > { %v1595_v18 = vmul.f32 %v3034_v13, %v3028_v44  ;;  %v2970_v13 = vld [vmem:[%s3186_s20 + $0x18] sm:$0xff]  }
 0x7bb   : > { %2872 = vmatprep.subr.bf16.mxu0 %v2871_v11 }
 0x7bc   : > { %2874 = vmatpush3.bf16.msra.mxu0 %v2871_v11 }
 0x7bd   : > { %v3036_v14 = vpop.eup %3035  ;;  %2877 = vmatprep.subr.msk.bf16.mxu0 %vm3334_vm2, %v2875_v12 }
 0x7be   : > { %v1594_v15 = vmul.f32 %v3036_v14, %v3030_v55  ;;  %v2971_v14 = vld [vmem:[%s3186_s20 + $0x20] sm:$0xff]  }
 0x7c0   : > { %2808 = vmatprep.mubr.msk.f32.mxu0 %vm1146_vm3, %v1594_v15  ;;  %v2972_v15 = vld [vmem:[%s3186_s20 + $0x28] sm:$0xff]  }
 0x7c1   : > { %2809 = vmatmul.mubr.msk.f32.vlgmr.msra.gmra.mrb[12].mxu0 %vm1146_vm3, %v1595_v18  ;;  %v2973_v18 = vld [vmem:[%s3186_s20 + $0x30] sm:$0xff]  }
 0x7c2   : > { %2815 = vmatprep.mubr.msk.f32.mxu0 %vm1054_vm1, %v1686_v58 }
 0x7c5   : > { %2880 = vmatpush3.bf16.xpose.msk.msra.mxu0 %vm3334_vm2, %v2875_v12  ;;  %v2969_v12 = vld [vmem:[%s3186_s20 + $0x10] sm:$0xff]  }
 0x7cc   : > { %2816 = vmatmul.mubr.msk.f32.vlgmr.msra.gmra.mrb[14].mxu0 %vm1054_vm1, %v1688_v59 }
 0x7cd   : > { %2208 = vmatprep.mubr.bf16.mxu0 %v3072_v56 }
 0x7e7   : > { %v1347_v21 = vpop.xlane.xlu0 %1346 }
 0x7e8   : > { %v1351_v23 = vsub.f32 %v1343_v0, %v1347_v21 }
 0x7ea   : > { %v1353_v29 = vmul.f32 1.442695, %v1351_v23  ;;  %v2974_v23 = vld [vmem:[%s3186_s20 + $0x38] sm:$0xff]  }
 0x7eb   : > { %v1362_v28 = vpop.xlane.xlu1 %1361 }
 0x7ec   : > { %3037 = vpow2.f32 %v1353_v29 }
 0x7f6   : > { %v3038_v37 = vpop.eup %3037 }
 0x7f7   : > { %v1357_v38 = vsel %vm1146_vm3, %v3038_v37, 0.0 }
 0x894   : > { %v3427_v19 = vpop.f32.mrb[12].mxu0 }
 0x895   : > { %v3429_v22 = vpop.f32.mrb[13].mxu0 }
 0x89f   : > { %v2817_v31 = vpop.f32.mrb[14].mxu0 }
 0x8a0   : > { %v1767_v32 = vpop.f32.mrb[15].mxu0  ;;  %v1777_v33 = vmul.f32 0.17677669, %v2817_v31 }
 0x8a1   : > { %v1776_v34 = vmul.f32 0.17677669, %v1767_v32 }
 0x8a2   : > { %v1779_v36 = vadd.f32 %v1777_v33, %v3353_v47 }
 0x8a3   : > { %v1778_v35 = vadd.f32 %v1776_v34, %v3358_v50 }
 0x8a4   : > { %v1783_v56 = vsel %vm1146_vm3, %v1779_v36, -inf }
 0x8a5   : > { %v1780_v40 = vsel %vm1146_vm3, %v1778_v35, -inf }
 0x8a6   : > { %1781 = vmax.xlane.f32.xlu0 %v1780_v40 }
 0x8aa   : > { %1784 = vmax.xlane.f32.xlu0 %v1783_v56 }
 0x8ae   : > { %1358 = vadd.xlane.f32.xlu0 %v1357_v38 }
 0x933   : > { %v1782_v39 = vpop.xlane.xlu0 %1781 }
 0x934   : > { %v1786_v41 = vsub.f32 %v1778_v35, %v1782_v39 }
 0x936   : > { %v1788_v43 = vmul.f32 1.442695, %v1786_v41 }
 0x937   : > { %v1785_v46 = vpop.xlane.xlu0 %1784 }
 0x938   : > { %3039 = vpow2.f32 %v1788_v43  ;;  %v1787_v48 = vsub.f32 %v1779_v36, %v1785_v46 }
 0x93a   : > { %v1790_v49 = vmul.f32 1.442695, %v1787_v48 }
 0x93b   : > { %v1359_v50 = vpop.xlane.xlu0 %1358 }
 0x93c   : > { %3041 = vpow2.f32 %v1790_v49  ;;  %v2975_v49 = vld [vmem:[%s3214_s6] ss:$8 sps:$4 sm:$0xff]  }
 0x93d   : > { %3043 = vrcp.f32 %v1359_v50  ;;  %v2977_v50 = vld [vmem:[%s3214_s6 + $0x4] ss:$8 sps:$4 sm:$0xff]  }
 0x93e   : > { %3045 = vrcp.f32 %v1362_v28  ;;  %2176 = vmatprep.subr.bf16.mxu0 %v2977_v50 }
 0x93f   : > { %2177 = vmatpush1.bf16.msra.mxu0 %v2975_v49 }
 0x942   : > { %v3040_v51 = vpop.eup %3039 }
 0x943   : > { %v1792_v47 = vsel %vm1146_vm3, %v3040_v51, 0.0 }
 0x944   : > { %1793 = vadd.xlane.f32.xlu0 %v1792_v47  ;;  %v2978_v47 = vld [vmem:[%s3214_s6 + $0x10] ss:$8 sps:$4 sm:$0xff]  }
 0x946   : > { %v3042_v52 = vpop.eup %3041 }
 0x947   : > { %v3044_v53 = vpop.eup %3043  ;;  %v1795_v54 = vsel %vm1146_vm3, %v3042_v52, 0.0 }
 0x948   : > { %1796 = vadd.xlane.f32.xlu1 %v1795_v54  ;;  %v1365_v44 = vmul.f32 %v3044_v53, %v3038_v37  ;;  %v3046_v61 = vpop.eup %3045 }
 0x94a   : > { %2794 = vmatprep.mubr.msk.f32.mxu1 %vm1146_vm3, %v1365_v44 }
 0x959   : > { %2931 = vrot.lane.b32.xlu1 %v3338_v42, %s3076_s1 }
 0x95a   : > { %2926 = vrot.lane.b32.xlu0 %v3338_v42, %s3075_s21  ;;  %v1366_v42 = vmul.f32 %v3046_v61, %v3414_v2  ;;  %v2987_v61 = vld [vmem:[%s3214_s6 + $0x40] ss:$8 sps:$4 sm:$0xff]  }
 0x9d1   : > { %v1794_v55 = vpop.xlane.xlu0 %1793 }
 0x9d2   : > { %3047 = vrcp.f32 %v1794_v55 }
 0x9d5   : > { %v1797_v45 = vpop.xlane.xlu1 %1796  ;;  %v2927_v57 = vpop.permute.xlu0 %2926 }
 0x9d6   : > { %3049 = vrcp.f32 %v1797_v45  ;;  %v2929_v58 = vunpack.i.h.bf16 %v2927_v57  ;;  %v2928_v59 = vunpack.i.l.bf16 %v2927_v57  ;;  %v2983_v45 = vld [vmem:[%s3214_s6 + $0x24] ss:$8 sps:$4 sm:$0xff]   ;;  %v2981_v57 = vld [vmem:[%s3214_s6 + $0x20] ss:$8 sps:$4 sm:$0xff]  }
 0x9d8   : > { %v2861_v60 = vpack.c.bf16 %v2929_v58, %v2928_v59  ;;  %v2986_v58 = vld [vmem:[%s3214_s6 + $0x34] ss:$8 sps:$4 sm:$0xff]   ;;  %v2984_v59 = vld [vmem:[%s3214_s6 + $0x30] ss:$8 sps:$4 sm:$0xff]  }
 0x9d9   : > { %v2932_v62 = vpop.permute.xlu1 %2931 }
 0x9da   : > { %v2934_v63 = vunpack.i.h.bf16 %v2932_v62  ;;  %v2933_v0 = vunpack.i.l.bf16 %v2932_v62  ;;  %2862 = vmatprep.subr.bf16.mxu1 %v2861_v60  ;;  %v2992_v62 = vld [vmem:[%s3214_s6 + $0x54] ss:$8 sps:$4 sm:$0xff]  }
 0x9db   : > { %2864 = vmatpush3.bf16.msra.mxu1 %v2861_v60  ;;  %v2989_v60 = vld [vmem:[%s3214_s6 + $0x44] ss:$8 sps:$4 sm:$0xff]  }
 0x9dc   : > { %v3048_v1 = vpop.eup %3047  ;;  %v2881_v3 = vpack.c.bf16 %v2934_v63, %v2933_v0  ;;  %v2990_v63 = vld [vmem:[%s3214_s6 + $0x50] ss:$8 sps:$4 sm:$0xff]   ;;  %v2995_v0 = vld [vmem:[%s3214_s6 + $0x64] ss:$8 sps:$4 sm:$0xff]  }
 0x9dd   : > { %v1800_v4 = vmul.f32 %v3048_v1, %v3040_v51  ;;  %v2980_v51 = vld [vmem:[%s3214_s6 + $0x14] ss:$8 sps:$4 sm:$0xff]   ;;  %v2993_v1 = vld [vmem:[%s3214_s6 + $0x60] ss:$8 sps:$4 sm:$0xff]  }
 0x9de   : > { %2795 = vmatmul.mubr.msk.f32.vlgmr.msra.gmra.mrb[4].mxu1 %vm1146_vm3, %v1366_v42  ;;  %2882 = vmatprep.subr.bf16.mxu1 %v2881_v3  ;;  %v2998_v42 = vld [vmem:[%s3214_s6 + $0x74] ss:$8 sps:$4 sm:$0xff]  }
 0x9df   : > { %2884 = vmatpush3.bf16.msra.mxu1 %v2881_v3  ;;  %2822 = vmatprep.mubr.msk.f32.mxu1 %vm1146_vm3, %v1800_v4  ;;  %v2996_v3 = vld [vmem:[%s3214_s6 + $0x70] ss:$8 sps:$4 sm:$0xff]   ;;  %v2999_v4 = vld [vmem:[%s3225_s5 + $0x40] sm:$0xff]  }
 0x9e0   : > { %v3050_v5 = vpop.eup %3049  ;;  %2825 = vmatprep.subr.bf16.mxu1 %v3071_v30  ;;  %2178 = vmatprep.subr.bf16.mxu0 %v2980_v51 }
 0x9e1   : > { %v1801_v6 = vmul.f32 %v3050_v5, %v3042_v52  ;;  %2179 = vmatpush1.bf16.msra.mxu0 %v2978_v47  ;;  %v3000_v5 = vld [vmem:[%s3225_s5] sm:$0xff]  }
 0x9e2   : > { %2180 = vmatprep.subr.bf16.mxu0 %v2983_v45 }
 0x9e3   : > { %2823 = vmatmul.mubr.msk.f32.vlgmr.msra.gmra.mrb[6].mxu1 %vm1146_vm3, %v1801_v6  ;;  %v3001_v6 = vld [vmem:[%s3225_s5 + $0x48] sm:$0xff]  }
 0x9e4   : > { %2841 = vmatprep.mubr.msk.bf16.mxu1 %vm3073_vm0, %v3071_v30  ;;  %2826 = vmatpush3.bf16.msra.mxu1 %v2967_v8 }
 0x9e5   : > { %2827 = vmatprep.subr.bf16.mxu1 %v3071_v30  ;;  %2181 = vmatpush1.bf16.msra.mxu0 %v2981_v57 }
 0x9e6   : > { %2182 = vmatprep.subr.bf16.mxu0 %v2986_v58 }
 0x9e8   : > { %2828 = vmatpush3.bf16.msra.mxu1 %v2968_v10 }
 0x9e9   : > { %2829 = vmatprep.subr.bf16.mxu1 %v3071_v30  ;;  %2183 = vmatpush1.bf16.msra.mxu0 %v2984_v59 }
 0x9ea   : > { %2184 = vmatprep.subr.bf16.mxu0 %v2989_v60 }
 0x9ec   : > { %2830 = vmatpush3.bf16.msra.mxu1 %v2969_v12 }
 0x9ed   : > { %2831 = vmatprep.subr.bf16.mxu1 %v3071_v30  ;;  %2185 = vmatpush1.bf16.msra.mxu0 %v2987_v61 }
 0x9ee   : > { %2186 = vmatprep.subr.bf16.mxu0 %v2992_v62 }
 0x9f0   : > { %2832 = vmatpush3.bf16.msra.mxu1 %v2970_v13 }
 0x9f1   : > { %2833 = vmatprep.subr.bf16.mxu1 %v3071_v30  ;;  %2187 = vmatpush1.bf16.msra.mxu0 %v2990_v63 }
 0x9f2   : > { %2188 = vmatprep.subr.bf16.mxu0 %v2995_v0 }
 0x9f4   : > { %2834 = vmatpush3.bf16.msra.mxu1 %v2971_v14 }
 0x9f5   : > { %2835 = vmatprep.subr.bf16.mxu1 %v3071_v30  ;;  %2189 = vmatpush1.bf16.msra.mxu0 %v2993_v1 }
 0x9f6   : > { %2190 = vmatprep.subr.bf16.mxu0 %v2998_v42 }
 0x9f8   : > { %2836 = vmatpush3.bf16.msra.mxu1 %v2972_v15  ;;  %v2637_v15 = vld [vmem:[%s3604_s16] ss:$0 sm:$0xff] }
 0x9f9   : > { %2837 = vmatprep.subr.bf16.mxu1 %v3071_v30  ;;  %2191 = vmatpush1.bf16.msra.mxu0 %v2996_v3 }
 0x9fc   : > { %2838 = vmatpush3.bf16.msra.mxu1 %v2973_v18 }
 0x9fd   : > { %2839 = vmatprep.subr.bf16.mxu1 %v3071_v30 }
 0xa00   : > { %2840 = vmatpush3.bf16.msra.mxu1 %v2974_v23 }
 0xa01   : > { %2727 = vmatprep.subr.bf16.mxu1 %v2999_v4 }
 0xab1   : > { %v2796_v2 = vpop.f32.mrb[4].mxu1 }
 0xab2   : > { %v1447_v7 = vpop.f32.mrb[5].mxu1 }
 0xab3   : > { %1458 = vrot.lane.b32.xlu0 %v1447_v7, %s3076_s1 }
 0xab6   : > { %v2824_v9 = vpop.f32.mrb[6].mxu1 }
 0xab7   : > { %v1880_v11 = vpop.f32.mrb[7].mxu1 }
 0xab8   : > { %1891 = vrot.lane.b32.xlu1 %v1880_v11, %s3076_s1 }
 0xabc   : > { %1893 = vrot.lane.b32.xlu1 %v2824_v9, %s3076_s1 }
 0xac0   : > { %1460 = vrot.lane.b32.xlu1 %v2796_v2, %s3076_s1  ;;  %v3002_v2 = vld [vmem:[%s3225_s5 + $0x8] sm:$0xff]  }
 0xb25   : > { %v1459_v21 = vpop.permute.xlu0 %1458 }
 0xb26   : > { %v1464_v29 = vsel %vm1054_vm1, %v3394_v25, %v1459_v21 }
 0xb27   : > { %1467 = vst.msk [vmem:[#allocation3] sm:$0xff] %vm1466_vm4, %v1464_v29  ;;  %v2638_v29 = vld [vmem:[%s3605_s30] ss:$0 sm:$0xff] }
 0xb2a   : > { %v1892_v31 = vpop.permute.xlu1 %1891 }
 0xb2b   : > { %v1897_v32 = vsel %vm1054_vm1, %v3429_v22, %v1892_v31 }
 0xb2c   : > { %1901 = vrot.lane.b32.xlu0 %v1897_v32, %s3074_s24 }
 0xb2e   : > { %v1894_v33 = vpop.permute.xlu1 %1893 }
 0xb2f   : > { %v1898_v34 = vsel %vm1054_vm1, %v3427_v19, %v1894_v33  ;;  %v2628_v19 = vld [vmem:[%s3603_s27] ss:$0 sm:$0xff] }
 0xb30   : > { %1903 = vrot.lane.b32.xlu1 %v1898_v34, %s3074_s24 }
 0xb32   : > { %v1461_v35 = vpop.permute.xlu1 %1460 }
 0xb33   : > { %v1465_v30 = vsel %vm1054_vm1, %v3392_v24, %v1461_v35  ;;  %v3003_v35 = vld [vmem:[%s3225_s5 + $0x50] sm:$0xff]  }
 0xb34   : > { %1468 = vst.msk [vmem:[#allocation3 + $0x8] sm:$0xff] %vm1466_vm4, %v1465_v30  ;;  %v3004_v30 = vld [vmem:[%s3225_s5 + $0x10] sm:$0xff]  }
 0xb9e   : > { %v1902_v25 = vpop.permute.xlu0 %1901 }
 0xb9f   : > { %1908 = vst.msk [vmem:[#allocation3] sm:$0xff] %vm1907_vm5, %v1902_v25  ;;  %v3005_v25 = vld [vmem:[%s3225_s5 + $0x58] sm:$0xff]  }
 0xba2   : > { %v1904_v40 = vpop.permute.xlu1 %1903 }
 0xba3   : > { %1909 = vst.msk [vmem:[#allocation3 + $0x8] sm:$0xff] %vm1907_vm5, %v1904_v40  ;;  %v3006_v40 = vld [vmem:[%s3225_s5 + $0x18] sm:$0xff]  }
 0xba6   : > { %v1910_v22 = vld [vmem:[#allocation3] sm:$0xff] }
 0xbaa   : > { %v1911_v36 = vld [vmem:[#allocation3 + $0x8] sm:$0xff] }
 0xbab   : > { %v1912_v56 = vpack.c.bf16 %v1911_v36, %v1910_v22  ;;  %v3007_v22 = vld [vmem:[%s3225_s5 + $0x60] sm:$0xff]  }
 0xbac   : > { %v3008_v36 = vld [vmem:[%s3225_s5 + $0x20] sm:$0xff]  }
 0xbad   : > { %2842 = vmatmul.mubr.bf16.vlgmr.msra.gmra.mrb[8].mxu1 %v1912_v56  ;;  %v3009_v56 = vld [vmem:[%s3225_s5 + $0x68] sm:$0xff]  }
 0xbae   : > { %2728 = vmatpush3.bf16.msra.mxu1 %v3000_v5 }
 0xbaf   : > { %2729 = vmatprep.subr.bf16.mxu1 %v3001_v6 }
 0xbb2   : > { %2730 = vmatpush3.bf16.msra.mxu1 %v3002_v2 }
 0xbb3   : > { %2731 = vmatprep.subr.bf16.mxu1 %v3003_v35 }
 0xbb6   : > { %2732 = vmatpush3.bf16.msra.mxu1 %v3004_v30 }
 0xbb7   : > { %2733 = vmatprep.subr.bf16.mxu1 %v3005_v25 }
 0xbba   : > { %2734 = vmatpush3.bf16.msra.mxu1 %v3006_v40 }
 0xbbb   : > { %2735 = vmatprep.subr.bf16.mxu1 %v3007_v22 }
 0xbbe   : > { %2736 = vmatpush3.bf16.msra.mxu1 %v3008_v36 }
 0xbbf   : > { %2737 = vmatprep.subr.bf16.mxu1 %v3009_v56 }
 0xc80   : > { %v2018_v24 = vpop.f32.mrb[8].mxu1 }
 0xc81   : > { %v2019_v37 = vadd.f32 %v2628_v19, %v2018_v24  ;;  %v2843_v38 = vpop.f32.mrb[9].mxu1  ;;  %v3011_v24 = vld [vmem:[%s3225_s5 + $0x70] sm:$0xff]  }
 0xc82   : > { %v2021_v39 = vpop.f32.mrb[10].mxu1  ;;  %v3013_v38 = vld [vmem:[%s3225_s5 + $0x78] sm:$0xff]  }
 0xc83   : > { %v3487_v41 = vadd.f32 %v2019_v37, %v3252_v26  ;;  %v2022_v43 = vadd.f32 %v2628_v19, %v2021_v39  ;;  %v2844_v46 = vpop.f32.mrb[11].mxu1  ;;  %v3010_v19 = vld [vmem:[%s3225_s5 + $0x28] sm:$0xff]   ;;  %v3012_v37 = vld [vmem:[%s3225_s5 + $0x30] sm:$0xff]   ;;  %v3014_v39 = vld [vmem:[%s3225_s5 + $0x38] sm:$0xff]  }
 0xc84   : > { %2738 = vmatpush3.bf16.msra.mxu1 %v3010_v19 }
 0xc85   : > { %v3490_v48 = vadd.f32 %v2022_v43, %v3257_v27  ;;  %2029 = vadd.xlane.f32.xlu0 %v3487_v41  ;;  %2739 = vmatprep.subr.bf16.mxu1 %v3011_v24  ;;  %v2084_v43 = vld [vmem:[%s3220_s17] sm:$0x3] }
 0xc86   : > { %v2089_v46 = vrot.slane %v2084_v43, %v817_v17  ;;  %v2093_v49 = vrot.slane %v2084_v43, %v821_v20 }
 0xc87   : > { %2031 = vadd.xlane.f32.xlu1 %v3490_v48 }
 0xc88   : > { %2740 = vmatpush3.bf16.msra.mxu1 %v3012_v37 }
 0xc89   : > { %2741 = vmatprep.subr.bf16.mxu1 %v3013_v38 }
 0xc8c   : > { %2742 = vmatpush3.bf16.msra.mxu1 %v3014_v39 }
 0xd12   : > { %v2030_v26 = vpop.xlane.xlu0 %2029 }
 0xd13   : > { %v2033_v52 = vmul.f32 0.0078125, %v2030_v26 }
 0xd14   : > { %v2032_v27 = vpop.xlane.xlu1 %2031 }
 0xd15   : > { %v2035_v53 = vsub.f32 %v3487_v41, %v2033_v52  ;;  %v2034_v54 = vmul.f32 0.0078125, %v2032_v27 }
 0xd17   : > { %v2036_v44 = vsub.f32 %v3490_v48, %v2034_v54  ;;  %v2037_v28 = vmul.f32 %v2035_v53, %v2035_v53 }
 0xd19   : > { %2039 = vadd.xlane.f32.xlu0 %v2037_v28  ;;  %v2038_v55 = vmul.f32 %v2036_v44, %v2036_v44 }
 0xd1d   : > { %2041 = vadd.xlane.f32.xlu0 %v2038_v55 }
 0xda6   : > { %v2040_v7 = vpop.xlane.xlu0 %2039 }
 0xda7   : > { %v2043_v8 = vmul.f32 0.0078125, %v2040_v7 }
 0xda9   : > { %v2045_v9 = vadd.f32 1e-05, %v2043_v8  ;;  %v2655_v8 = vld [vmem:[%s684_s19] ss:$0 sm:$0xff] }
 0xdaa   : > { %v2042_v10 = vpop.xlane.xlu0 %2041 }
 0xdab   : > { %3051 = vrsqrt.f32 %v2045_v9  ;;  %v2044_v11 = vmul.f32 0.0078125, %v2042_v10 }
 0xdad   : > { %v2046_v12 = vadd.f32 1e-05, %v2044_v11 }
 0xdaf   : > { %3053 = vrsqrt.f32 %v2046_v12 }
 0xdb5   : > { %v3052_v13 = vpop.eup %3051 }
 0xdb6   : > { %v2049_v14 = vmul.f32 %v3052_v13, %v2035_v53 }
 0xdb8   : > { %v2057_v23 = vmul.f32 %v2637_v15, %v2049_v14 }
 0xdb9   : > { %v3054_v18 = vpop.eup %3053 }
 0xdba   : > { %v2050_v21 = vmul.f32 %v3054_v18, %v2036_v44  ;;  %v2065_v32 = vadd.f32 %v2638_v29, %v2057_v23 }
 0xdbc   : > { %v2058_v31 = vmul.f32 %v2637_v15, %v2050_v21 }
 0xdbe   : > { %v2066_v33 = vadd.f32 %v2638_v29, %v2058_v31 }
 0xdc0   : > { %v2067_v34 = vpack.c.bf16 %v2066_v33, %v2065_v32 }
 0xdc2   : > { %2209 = vmatmul.mubr.bf16.vlgmr.msra.gmra.mrb[16].mxu0 %v2067_v34 }
 0xe95   : > { %v2210_v50 = vpop.f32.mrb[16].mxu0 }
 0xe96   : > { %v2211_v51 = vadd.f32 %v2210_v50, %v2089_v46  ;;  %v2212_v47 = vpop.f32.mrb[17].mxu0 }
 0xe97   : > { %v2213_v26 = vadd.f32 %v2212_v47, %v2093_v49  ;;  %v2214_v52 = vpop.f32.mrb[18].mxu0 }
 0xe98   : > { %v2223_v27 = vmul.f32 0.70710677, %v2211_v51  ;;  %v2215_v53 = vadd.f32 %v2214_v52, %v2089_v46  ;;  %v2216_v54 = vpop.f32.mrb[19].mxu0  ;;  %v2219_v60 = vmul.f32 0.5, %v2211_v51 }
 0xe99   : > { %v2224_v44 = vmul.f32 0.70710677, %v2213_v26  ;;  %v2217_v28 = vadd.f32 %v2216_v54, %v2093_v49  ;;  %v2220_v63 = vmul.f32 0.5, %v2213_v26 }
 0xe9a   : > { %3055 = verf.f32 %v2223_v27  ;;  %v2225_v55 = vmul.f32 0.70710677, %v2215_v53  ;;  %v2221_v61 = vmul.f32 0.5, %v2215_v53 }
 0xe9b   : > { %3057 = verf.f32 %v2224_v44  ;;  %v2226_v45 = vmul.f32 0.70710677, %v2217_v28  ;;  %v2222_v0 = vmul.f32 0.5, %v2217_v28 }
 0xe9c   : > { %3059 = verf.f32 %v2225_v55 }
 0xe9d   : > { %3061 = verf.f32 %v2226_v45 }
 0xea4   : > { %v3056_v17 = vpop.eup %3055 }
 0xea5   : > { %v3058_v57 = vpop.eup %3057  ;;  %v2231_v16 = vadd.f32 1.0, %v3056_v17 }
 0xea6   : > { %v3060_v20 = vpop.eup %3059  ;;  %v2232_v58 = vadd.f32 1.0, %v3058_v57 }
 0xea7   : > { %v3062_v59 = vpop.eup %3061  ;;  %v2233_v62 = vadd.f32 1.0, %v3060_v20  ;;  %v2235_v42 = vmul.f32 %v2231_v16, %v2219_v60 }
 0xea8   : > { %v2234_v1 = vadd.f32 1.0, %v3062_v59  ;;  %v2236_v4 = vmul.f32 %v2232_v58, %v2220_v63 }
 0xea9   : > { %v2237_v3 = vmul.f32 %v2233_v62, %v2221_v61 }
 0xeaa   : > { %v2238_v5 = vmul.f32 %v2234_v1, %v2222_v0 }
 0xeab   : > { %v2239_v6 = vpack.c.bf16 %v2237_v3, %v2235_v42 }
 0xeac   : > { %v2240_v2 = vpack.c.bf16 %v2238_v5, %v2236_v4 }
 0xeae   : > { %2408 = vmatprep.mubr.bf16.mxu1 %v2240_v2 }
 0xeaf   : > { %2409 = vmatmul.mubr.bf16.vlgmr.msra.gmra.mrb[12].mxu1 %v2239_v6 }
 0xf82   : > { %v2743_v7 = vpop.f32.mrb[12].mxu1 }
 0xf83   : > { %v2744_v9 = vpop.f32.mrb[13].mxu1 }
 0xf84   : > { %v2745_v10 = vadd.f32 %v2744_v9, %v2743_v7  ;;  %v2746_v11 = vpop.f32.mrb[14].mxu1 }
 0xf85   : > { %v2747_v12 = vpop.f32.mrb[15].mxu1 }
 0xf86   : > { %v2411_v13 = vadd.f32 %v2745_v10, %v2655_v8  ;;  %v2748_v14 = vadd.f32 %v2747_v12, %v2746_v11 }
 0xf88   : > { %v2417_v15 = vadd.f32 %v2411_v13, %v3487_v41  ;;  %v2414_v18 = vadd.f32 %v2748_v14, %v2655_v8 }
 0xf8a   : > { %2419 = vst [vmem:[%s3595_s4] sm:$0xff] %v2417_v15  ;;  %v2418_v21 = vadd.f32 %v2414_v18, %v3490_v48 }
 0xf8c   : > { %2420 = vst [vmem:[%s3595_s4 + $0x8] sm:$0xff] %v2418_v21 }
 0xf8d PF: > { %s3606_s23 = sld [smem:[#allocation4_spill]] }
 0xf93   : > { %s26_s21 = sadd.s32 1, %s3606_s23  }
 0xf94   : > { %p23_p5 = scmp.ge.s32.totalorder %s26_s21, 4  }
 0xf96   :  { %25 = sbr.rel (!%p23_p5) target bundleno = 8 (0x8), region = 147 }

// kernel: _lambda_.3
= control target key start
LH: loop header
LB: loop body
LE: loop exit
PB: predicated region body
PF: predicated region fallthrough
CT: control target
= control target key end

     0   :  { %s3455_s1 = inlined_call_operand.vmem [shape: bf16[3072,128], index: 1, kind: input, shape index: {}]   ;;  %s3456_s0 = inlined_call_operand.vmem [shape: bf16[8,3072], index: 0, kind: input, shape index: {}]   ;;  %s3457_s2 = inlined_call_operand.vmem [shape: f32[8,128], index: 2, kind: output, shape index: {}]  }
   0x1   :  { %v2609_v0 = vld [vmem:[%s3455_s1 + $0x40] sm:$0xff]   ;;  %v2613_v4 = vld [vmem:[%s3455_s1 + $0x48] sm:$0xff]   ;;  %v2617_v8 = vld [vmem:[%s3455_s1 + $0x50] sm:$0xff]  }
   0x2   :  { %v2610_v1 = vld [vmem:[%s3455_s1 + $0xc0] sm:$0xff]   ;;  %2345 = vmatprep.subr.bf16.mxu0 %v2609_v0  ;;  %v2614_v5 = vld [vmem:[%s3455_s1 + $0xc8] sm:$0xff]   ;;  %v2618_v9 = vld [vmem:[%s3455_s1 + $0xd0] sm:$0xff]  }
   0x3   :  { %v2611_v2 = vld [vmem:[%s3455_s1] sm:$0xff]   ;;  %2367 = vmatprep.subr.bf16.mxu1 %v2610_v1  ;;  %v2615_v6 = vld [vmem:[%s3455_s1 + $0x8] sm:$0xff]   ;;  %v2619_v10 = vld [vmem:[%s3455_s1 + $0x10] sm:$0xff]  }
   0x4   :  { %v2612_v3 = vld [vmem:[%s3455_s1 + $0x80] sm:$0xff]   ;;  %2346 = vmatpush3.bf16.msra.mxu0 %v2611_v2  ;;  %v2616_v7 = vld [vmem:[%s3455_s1 + $0x88] sm:$0xff]   ;;  %v2620_v11 = vld [vmem:[%s3455_s1 + $0x90] sm:$0xff]  }
   0x5   :  { %2368 = vmatpush3.bf16.msra.mxu1 %v2612_v3  ;;  %2347 = vmatprep.subr.bf16.mxu0 %v2613_v4  ;;  %v2621_v12 = vld [vmem:[%s3455_s1 + $0x58] sm:$0xff]   ;;  %v2625_v16 = vld [vmem:[%s3455_s1 + $0x60] sm:$0xff]   ;;  %v2629_v20 = vld [vmem:[%s3455_s1 + $0x68] sm:$0xff]  }
   0x6   :  { %2369 = vmatprep.subr.bf16.mxu1 %v2614_v5  ;;  %v2622_v13 = vld [vmem:[%s3455_s1 + $0xd8] sm:$0xff]   ;;  %v2626_v17 = vld [vmem:[%s3455_s1 + $0xe0] sm:$0xff]   ;;  %v2630_v21 = vld [vmem:[%s3455_s1 + $0xe8] sm:$0xff]  }
   0x7   :  { %v2623_v14 = vld [vmem:[%s3455_s1 + $0x18] sm:$0xff]   ;;  %v2627_v18 = vld [vmem:[%s3455_s1 + $0x20] sm:$0xff]   ;;  %v2631_v22 = vld [vmem:[%s3455_s1 + $0x28] sm:$0xff]  }
   0x8   :  { %2348 = vmatpush3.bf16.msra.mxu0 %v2615_v6  ;;  %v2624_v15 = vld [vmem:[%s3455_s1 + $0x98] sm:$0xff]   ;;  %v2628_v19 = vld [vmem:[%s3455_s1 + $0xa0] sm:$0xff]   ;;  %v2632_v23 = vld [vmem:[%s3455_s1 + $0xa8] sm:$0xff]  }
   0x9   :  { %2370 = vmatpush3.bf16.msra.mxu1 %v2616_v7  ;;  %2349 = vmatprep.subr.bf16.mxu0 %v2617_v8  ;;  %v2633_v24 = vld [vmem:[%s3455_s1 + $0x70] sm:$0xff]   ;;  %v2637_v28 = vld [vmem:[%s3455_s1 + $0x78] sm:$0xff]   ;;  %v12_v32 = vld [vmem:[%s3456_s0] sm:$0xff] }
   0xa   :  { %2371 = vmatprep.subr.bf16.mxu1 %v2618_v9  ;;  %v2634_v25 = vld [vmem:[%s3455_s1 + $0xf0] sm:$0xff]   ;;  %v2638_v29 = vld [vmem:[%s3455_s1 + $0xf8] sm:$0xff]   ;;  %v13_v33 = vld [vmem:[%s3456_s0 + $0x8] sm:$0xff]  ;;  %v2129_v34 = vcombine.low %v12_v32, %v12_v32  ;;  %v2130_v35 = vcombine.high %v12_v32, %v12_v32 }
   0xb   :  { %v2635_v26 = vld [vmem:[%s3455_s1 + $0x30] sm:$0xff]   ;;  %v2639_v30 = vld [vmem:[%s3455_s1 + $0x38] sm:$0xff]   ;;  %v2131_v36 = vcombine.low %v13_v33, %v13_v33  ;;  %v2132_v37 = vcombine.high %v13_v33, %v13_v33  ;;  %v2645_v38 = vld [vmem:[%s3455_s1 + $0x140] sm:$0xff]  }
   0xc   :  { %2350 = vmatpush3.bf16.msra.mxu0 %v2619_v10  ;;  %v2636_v27 = vld [vmem:[%s3455_s1 + $0xb0] sm:$0xff]   ;;  %v2640_v31 = vld [vmem:[%s3455_s1 + $0xb8] sm:$0xff]   ;;  %v2646_v39 = vld [vmem:[%s3455_s1 + $0x1c0] sm:$0xff]   ;;  %1676 = vmatprep.mubr.bf16.mxu0 %v2130_v35 }
   0xd   :  { %2372 = vmatpush3.bf16.msra.mxu1 %v2620_v11  ;;  %2351 = vmatprep.subr.bf16.mxu0 %v2621_v12  ;;  %v2647_v40 = vld [vmem:[%s3455_s1 + $0x100] sm:$0xff]   ;;  %v2649_v42 = vld [vmem:[%s3455_s1 + $0x148] sm:$0xff]   ;;  %v2653_v46 = vld [vmem:[%s3455_s1 + $0x150] sm:$0xff]  }
   0xe   :  { %2373 = vmatprep.subr.bf16.mxu1 %v2622_v13  ;;  %1716 = vmatprep.mubr.bf16.mxu1 %v2132_v37  ;;  %v2648_v41 = vld [vmem:[%s3455_s1 + $0x180] sm:$0xff]   ;;  %v2650_v43 = vld [vmem:[%s3455_s1 + $0x1c8] sm:$0xff]   ;;  %v2654_v47 = vld [vmem:[%s3455_s1 + $0x1d0] sm:$0xff]  }
   0xf   :  { %v2651_v44 = vld [vmem:[%s3455_s1 + $0x108] sm:$0xff]   ;;  %v2655_v48 = vld [vmem:[%s3455_s1 + $0x110] sm:$0xff]   ;;  %v2657_v50 = vld [vmem:[%s3455_s1 + $0x158] sm:$0xff]  }
  0x10   :  { %2352 = vmatpush3.bf16.msra.mxu0 %v2623_v14  ;;  %v2652_v45 = vld [vmem:[%s3455_s1 + $0x188] sm:$0xff]   ;;  %v2656_v49 = vld [vmem:[%s3455_s1 + $0x190] sm:$0xff]   ;;  %v2658_v51 = vld [vmem:[%s3455_s1 + $0x1d8] sm:$0xff]  }
  0x11   :  { %2374 = vmatpush3.bf16.msra.mxu1 %v2624_v15  ;;  %2353 = vmatprep.subr.bf16.mxu0 %v2625_v16  ;;  %v2659_v52 = vld [vmem:[%s3455_s1 + $0x118] sm:$0xff]   ;;  %v2661_v54 = vld [vmem:[%s3455_s1 + $0x160] sm:$0xff]   ;;  %v2665_v58 = vld [vmem:[%s3455_s1 + $0x168] sm:$0xff]  }
  0x12   :  { %2375 = vmatprep.subr.bf16.mxu1 %v2626_v17  ;;  %v2660_v53 = vld [vmem:[%s3455_s1 + $0x198] sm:$0xff]   ;;  %v2662_v55 = vld [vmem:[%s3455_s1 + $0x1e0] sm:$0xff]   ;;  %v2666_v59 = vld [vmem:[%s3455_s1 + $0x1e8] sm:$0xff]  }
  0x13   :  { %v2663_v56 = vld [vmem:[%s3455_s1 + $0x120] sm:$0xff]   ;;  %v2667_v60 = vld [vmem:[%s3455_s1 + $0x128] sm:$0xff]   ;;  %v2669_v62 = vld [vmem:[%s3455_s1 + $0x170] sm:$0xff]  }
  0x14   :  { %2354 = vmatpush3.bf16.msra.mxu0 %v2627_v18  ;;  %v2664_v57 = vld [vmem:[%s3455_s1 + $0x1a0] sm:$0xff]   ;;  %v2668_v61 = vld [vmem:[%s3455_s1 + $0x1a8] sm:$0xff]   ;;  %v2670_v63 = vld [vmem:[%s3455_s1 + $0x1f0] sm:$0xff]  }
  0x15   :  { %2376 = vmatpush3.bf16.msra.mxu1 %v2628_v19  ;;  %2355 = vmatprep.subr.bf16.mxu0 %v2629_v20  ;;  %v2671_v0 = vld [vmem:[%s3455_s1 + $0x130] sm:$0xff]   ;;  %v2673_v2 = vld [vmem:[%s3455_s1 + $0x178] sm:$0xff]   ;;  %v2681_v12 = vld [vmem:[%s3455_s1 + $0x240] sm:$0xff]  }
  0x16   :  { %2377 = vmatprep.subr.bf16.mxu1 %v2630_v21  ;;  %v2672_v1 = vld [vmem:[%s3455_s1 + $0x1b0] sm:$0xff]   ;;  %v2674_v3 = vld [vmem:[%s3455_s1 + $0x1f8] sm:$0xff]   ;;  %v2682_v13 = vld [vmem:[%s3455_s1 + $0x2c0] sm:$0xff]  }
  0x17   :  { %v2675_v4 = vld [vmem:[%s3455_s1 + $0x138] sm:$0xff]   ;;  %v14_v6 = vld [vmem:[%s3456_s0 + $0x10] sm:$0xff]  ;;  %v2683_v14 = vld [vmem:[%s3455_s1 + $0x200] sm:$0xff]  }
  0x18   :  { %2356 = vmatpush3.bf16.msra.mxu0 %v2631_v22  ;;  %v2676_v5 = vld [vmem:[%s3455_s1 + $0x1b8] sm:$0xff]   ;;  %v2133_v7 = vcombine.low %v14_v6, %v14_v6  ;;  %v2134_v8 = vcombine.high %v14_v6, %v14_v6  ;;  %v2684_v15 = vld [vmem:[%s3455_s1 + $0x280] sm:$0xff]   ;;  %v2685_v16 = vld [vmem:[%s3455_s1 + $0x248] sm:$0xff]  }
  0x19   :  { %2378 = vmatpush3.bf16.msra.mxu1 %v2632_v23  ;;  %2357 = vmatprep.subr.bf16.mxu0 %v2633_v24  ;;  %v15_v9 = vld [vmem:[%s3456_s0 + $0x18] sm:$0xff]  ;;  %v2686_v17 = vld [vmem:[%s3455_s1 + $0x2c8] sm:$0xff]   ;;  %v2689_v20 = vld [vmem:[%s3455_s1 + $0x250] sm:$0xff]  }
  0x1a   :  { %2379 = vmatprep.subr.bf16.mxu1 %v2634_v25  ;;  %v2135_v10 = vcombine.low %v15_v9, %v15_v9  ;;  %v2136_v11 = vcombine.high %v15_v9, %v15_v9  ;;  %v2687_v18 = vld [vmem:[%s3455_s1 + $0x208] sm:$0xff]   ;;  %v2690_v21 = vld [vmem:[%s3455_s1 + $0x2d0] sm:$0xff]   ;;  %v2693_v24 = vld [vmem:[%s3455_s1 + $0x258] sm:$0xff]  }
  0x1b   :  { %v2688_v19 = vld [vmem:[%s3455_s1 + $0x288] sm:$0xff]   ;;  %v2691_v22 = vld [vmem:[%s3455_s1 + $0x210] sm:$0xff]   ;;  %v2694_v25 = vld [vmem:[%s3455_s1 + $0x2d8] sm:$0xff]  }
  0x1c   :  { %2358 = vmatpush3.bf16.msra.mxu0 %v2635_v26  ;;  %v2692_v23 = vld [vmem:[%s3455_s1 + $0x290] sm:$0xff]   ;;  %v2695_v26 = vld [vmem:[%s3455_s1 + $0x218] sm:$0xff]   ;;  %v2701_v32 = vld [vmem:[%s3455_s1 + $0x268] sm:$0xff]  }
  0x1d   :  { %2380 = vmatpush3.bf16.msra.mxu1 %v2636_v27  ;;  %2359 = vmatprep.subr.bf16.mxu0 %v2637_v28  ;;  %v2696_v27 = vld [vmem:[%s3455_s1 + $0x298] sm:$0xff]   ;;  %v2697_v28 = vld [vmem:[%s3455_s1 + $0x260] sm:$0xff]   ;;  %v2702_v33 = vld [vmem:[%s3455_s1 + $0x2e8] sm:$0xff]  }
  0x1e   :  { %2381 = vmatprep.subr.bf16.mxu1 %v2638_v29  ;;  %v2698_v29 = vld [vmem:[%s3455_s1 + $0x2e0] sm:$0xff]   ;;  %v2704_v35 = vld [vmem:[%s3455_s1 + $0x2a8] sm:$0xff]   ;;  %v2706_v37 = vld [vmem:[%s3455_s1 + $0x2f0] sm:$0xff]  }
  0x1f   :  { %v2737_v6 = vld [vmem:[%s3455_s1 + $0x368] sm:$0xff]  }
  0x20   :  { %2360 = vmatpush3.bf16.msra.mxu0 %v2639_v30  ;;  %v2699_v30 = vld [vmem:[%s3455_s1 + $0x220] sm:$0xff]   ;;  %v2740_v9 = vld [vmem:[%s3455_s1 + $0x3a8] sm:$0xff]  }
  0x21   :  { %2382 = vmatpush3.bf16.msra.mxu1 %v2640_v31  ;;  %2389 = vmatprep.subr.bf16.mxu0 %v2645_v38  ;;  %v2700_v31 = vld [vmem:[%s3455_s1 + $0x2a0] sm:$0xff]   ;;  %v2707_v38 = vld [vmem:[%s3455_s1 + $0x230] sm:$0xff]  }
  0x22   :  { %2411 = vmatprep.subr.bf16.mxu1 %v2646_v39  ;;  %v2708_v39 = vld [vmem:[%s3455_s1 + $0x2b0] sm:$0xff]  }
  0x23   :  { %1677 = vmatmul.mubr.bf16.vlgmr.msra.gmra.mrb[0].mxu0 %v2129_v34  ;;  %v2703_v34 = vld [vmem:[%s3455_s1 + $0x228] sm:$0xff]  }
  0x24   :  { %1717 = vmatmul.mubr.bf16.vlgmr.msra.gmra.mrb[0].mxu1 %v2131_v36  ;;  %2390 = vmatpush3.bf16.msra.mxu0 %v2647_v40  ;;  %v2705_v36 = vld [vmem:[%s3455_s1 + $0x270] sm:$0xff]   ;;  %v2709_v40 = vld [vmem:[%s3455_s1 + $0x278] sm:$0xff]  }
  0x25   :  { %2412 = vmatpush3.bf16.msra.mxu1 %v2648_v41  ;;  %2391 = vmatprep.subr.bf16.mxu0 %v2649_v42  ;;  %v2710_v41 = vld [vmem:[%s3455_s1 + $0x2f8] sm:$0xff]  }
  0x26   :  { %2413 = vmatprep.subr.bf16.mxu1 %v2650_v43  ;;  %1756 = vmatprep.mubr.bf16.mxu0 %v2134_v8  ;;  %v2711_v42 = vld [vmem:[%s3455_s1 + $0x238] sm:$0xff]   ;;  %v2739_v8 = vld [vmem:[%s3455_s1 + $0x328] sm:$0xff]  }
  0x27   :  { %1796 = vmatprep.mubr.bf16.mxu1 %v2136_v11  ;;  %v2712_v43 = vld [vmem:[%s3455_s1 + $0x2b8] sm:$0xff]   ;;  %v2742_v11 = vld [vmem:[%s3455_s1 + $0x3f0] sm:$0xff]  }
  0x28   :  { %2392 = vmatpush3.bf16.msra.mxu0 %v2651_v44  ;;  %v16_v44 = vld [vmem:[%s3456_s0 + $0x20] sm:$0xff] }
  0x29   :  { %2414 = vmatpush3.bf16.msra.mxu1 %v2652_v45  ;;  %2393 = vmatprep.subr.bf16.mxu0 %v2653_v46  ;;  %v17_v45 = vld [vmem:[%s3456_s0 + $0x28] sm:$0xff]  ;;  %v2137_v46 = vcombine.low %v16_v44, %v16_v44 }
  0x2a   :  { %2415 = vmatprep.subr.bf16.mxu1 %v2654_v47  ;;  %v2138_v47 = vcombine.high %v16_v44, %v16_v44  ;;  %v2773_v44 = vld [vmem:[%s3455_s1 + $0x468] sm:$0xff]  }
  0x2c   :  { %2394 = vmatpush3.bf16.msra.mxu0 %v2655_v48  ;;  %v2139_v48 = vcombine.low %v17_v45, %v17_v45 }
  0x2d   :  { %2416 = vmatpush3.bf16.msra.mxu1 %v2656_v49  ;;  %2395 = vmatprep.subr.bf16.mxu0 %v2657_v50  ;;  %v2140_v49 = vcombine.high %v17_v45, %v17_v45  ;;  %v2717_v50 = vld [vmem:[%s3455_s1 + $0x340] sm:$0xff]   ;;  %v2774_v45 = vld [vmem:[%s3455_s1 + $0x4e8] sm:$0xff]  }
  0x2e   :  { %2417 = vmatprep.subr.bf16.mxu1 %v2658_v51  ;;  %v2718_v51 = vld [vmem:[%s3455_s1 + $0x3c0] sm:$0xff]  }
  0x30   :  { %2396 = vmatpush3.bf16.msra.mxu0 %v2659_v52  ;;  %v2719_v52 = vld [vmem:[%s3455_s1 + $0x300] sm:$0xff]  }
  0x31   :  { %2418 = vmatpush3.bf16.msra.mxu1 %v2660_v53  ;;  %2397 = vmatprep.subr.bf16.mxu0 %v2661_v54  ;;  %v2720_v53 = vld [vmem:[%s3455_s1 + $0x380] sm:$0xff]   ;;  %v2721_v54 = vld [vmem:[%s3455_s1 + $0x348] sm:$0xff]  }
  0x32   :  { %2419 = vmatprep.subr.bf16.mxu1 %v2662_v55  ;;  %v2722_v55 = vld [vmem:[%s3455_s1 + $0x3c8] sm:$0xff]  }
  0x34   :  { %2398 = vmatpush3.bf16.msra.mxu0 %v2663_v56  ;;  %v2723_v56 = vld [vmem:[%s3455_s1 + $0x308] sm:$0xff]  }
  0x35   :  { %2420 = vmatpush3.bf16.msra.mxu1 %v2664_v57  ;;  %2399 = vmatprep.subr.bf16.mxu0 %v2665_v58  ;;  %v2724_v57 = vld [vmem:[%s3455_s1 + $0x388] sm:$0xff]   ;;  %v2725_v58 = vld [vmem:[%s3455_s1 + $0x350] sm:$0xff]  }
  0x36   :  { %2421 = vmatprep.subr.bf16.mxu1 %v2666_v59  ;;  %v2726_v59 = vld [vmem:[%s3455_s1 + $0x3d0] sm:$0xff]  }
  0x38   :  { %2400 = vmatpush3.bf16.msra.mxu0 %v2667_v60  ;;  %v2727_v60 = vld [vmem:[%s3455_s1 + $0x310] sm:$0xff]  }
  0x39   :  { %2422 = vmatpush3.bf16.msra.mxu1 %v2668_v61  ;;  %2401 = vmatprep.subr.bf16.mxu0 %v2669_v62  ;;  %v2728_v61 = vld [vmem:[%s3455_s1 + $0x390] sm:$0xff]   ;;  %v2729_v62 = vld [vmem:[%s3455_s1 + $0x358] sm:$0xff]  }
  0x3a   :  { %2423 = vmatprep.subr.bf16.mxu1 %v2670_v63  ;;  %v2730_v63 = vld [vmem:[%s3455_s1 + $0x3d8] sm:$0xff]  }
  0x3c   :  { %2402 = vmatpush3.bf16.msra.mxu0 %v2671_v0  ;;  %v2731_v0 = vld [vmem:[%s3455_s1 + $0x318] sm:$0xff]  }
  0x3d   :  { %2424 = vmatpush3.bf16.msra.mxu1 %v2672_v1  ;;  %2403 = vmatprep.subr.bf16.mxu0 %v2673_v2  ;;  %v2732_v1 = vld [vmem:[%s3455_s1 + $0x398] sm:$0xff]   ;;  %v2733_v2 = vld [vmem:[%s3455_s1 + $0x360] sm:$0xff]  }
  0x3e   :  { %2425 = vmatprep.subr.bf16.mxu1 %v2674_v3  ;;  %v2734_v3 = vld [vmem:[%s3455_s1 + $0x3e0] sm:$0xff]  }
  0x40   :  { %2404 = vmatpush3.bf16.msra.mxu0 %v2675_v4  ;;  %v2735_v4 = vld [vmem:[%s3455_s1 + $0x320] sm:$0xff]  }
  0x41   :  { %2426 = vmatpush3.bf16.msra.mxu1 %v2676_v5  ;;  %2433 = vmatprep.subr.bf16.mxu0 %v2681_v12  ;;  %v2736_v5 = vld [vmem:[%s3455_s1 + $0x3a0] sm:$0xff]   ;;  %v2743_v12 = vld [vmem:[%s3455_s1 + $0x330] sm:$0xff]  }
  0x42   :  { %2455 = vmatprep.subr.bf16.mxu1 %v2682_v13  ;;  %v2744_v13 = vld [vmem:[%s3455_s1 + $0x3b0] sm:$0xff]  }
  0x43   :  { %1757 = vmatmul.mubr.bf16.vlgmr.msra.gmra.mrb[4].mxu0 %v2133_v7  ;;  %v2738_v7 = vld [vmem:[%s3455_s1 + $0x3e8] sm:$0xff]  }
  0x44   :  { %1797 = vmatmul.mubr.bf16.vlgmr.msra.gmra.mrb[4].mxu1 %v2135_v10  ;;  %2434 = vmatpush3.bf16.msra.mxu0 %v2683_v14  ;;  %v2741_v10 = vld [vmem:[%s3455_s1 + $0x370] sm:$0xff]   ;;  %v2745_v14 = vld [vmem:[%s3455_s1 + $0x378] sm:$0xff]  }
  0x45   :  { %2456 = vmatpush3.bf16.msra.mxu1 %v2684_v15  ;;  %2435 = vmatprep.subr.bf16.mxu0 %v2685_v16  ;;  %v2746_v15 = vld [vmem:[%s3455_s1 + $0x3f8] sm:$0xff]  }
  0x46   :  { %2457 = vmatprep.subr.bf16.mxu1 %v2686_v17  ;;  %1836 = vmatprep.mubr.bf16.mxu0 %v2138_v47  ;;  %v2747_v16 = vld [vmem:[%s3455_s1 + $0x338] sm:$0xff]   ;;  %v2776_v47 = vld [vmem:[%s3455_s1 + $0x4a8] sm:$0xff]  }
  0x47   :  { %1876 = vmatprep.mubr.bf16.mxu1 %v2140_v49  ;;  %v2748_v17 = vld [vmem:[%s3455_s1 + $0x3b8] sm:$0xff]   ;;  %v2778_v49 = vld [vmem:[%s3455_s1 + $0x4f0] sm:$0xff]  }
  0x48   :  { %2436 = vmatpush3.bf16.msra.mxu0 %v2687_v18  ;;  %v18_v18 = vld [vmem:[%s3456_s0 + $0x30] sm:$0xff] }
  0x49   :  { %2458 = vmatpush3.bf16.msra.mxu1 %v2688_v19  ;;  %2437 = vmatprep.subr.bf16.mxu0 %v2689_v20  ;;  %v19_v19 = vld [vmem:[%s3456_s0 + $0x38] sm:$0xff]  ;;  %v2141_v20 = vcombine.low %v18_v18, %v18_v18 }
  0x4a   :  { %2459 = vmatprep.subr.bf16.mxu1 %v2690_v21  ;;  %v2142_v21 = vcombine.high %v18_v18, %v18_v18  ;;  %v2809_v18 = vld [vmem:[%s3455_s1 + $0x568] sm:$0xff]  }
  0x4c   :  { %2438 = vmatpush3.bf16.msra.mxu0 %v2691_v22  ;;  %v2143_v22 = vcombine.low %v19_v19, %v19_v19 }
  0x4d   :  { %2460 = vmatpush3.bf16.msra.mxu1 %v2692_v23  ;;  %2439 = vmatprep.subr.bf16.mxu0 %v2693_v24  ;;  %v2753_v23 = vld [vmem:[%s3455_s1 + $0x440] sm:$0xff]   ;;  %v2144_v24 = vcombine.high %v19_v19, %v19_v19  ;;  %v2810_v19 = vld [vmem:[%s3455_s1 + $0x5e8] sm:$0xff]  }
  0x4e   :  { %2461 = vmatprep.subr.bf16.mxu1 %v2694_v25  ;;  %v2754_v25 = vld [vmem:[%s3455_s1 + $0x4c0] sm:$0xff]  }
  0x50   :  { %2440 = vmatpush3.bf16.msra.mxu0 %v2695_v26  ;;  %v2755_v26 = vld [vmem:[%s3455_s1 + $0x400] sm:$0xff]  }
  0x51   :  { %2462 = vmatpush3.bf16.msra.mxu1 %v2696_v27  ;;  %2441 = vmatprep.subr.bf16.mxu0 %v2697_v28  ;;  %v2756_v27 = vld [vmem:[%s3455_s1 + $0x480] sm:$0xff]   ;;  %v2757_v28 = vld [vmem:[%s3455_s1 + $0x448] sm:$0xff]  }
  0x52   :  { %2463 = vmatprep.subr.bf16.mxu1 %v2698_v29  ;;  %v2758_v29 = vld [vmem:[%s3455_s1 + $0x4c8] sm:$0xff]  }
  0x54   :  { %2442 = vmatpush3.bf16.msra.mxu0 %v2699_v30  ;;  %v2759_v30 = vld [vmem:[%s3455_s1 + $0x408] sm:$0xff]  }
  0x55   :  { %2464 = vmatpush3.bf16.msra.mxu1 %v2700_v31  ;;  %2443 = vmatprep.subr.bf16.mxu0 %v2701_v32  ;;  %v2760_v31 = vld [vmem:[%s3455_s1 + $0x488] sm:$0xff]   ;;  %v2761_v32 = vld [vmem:[%s3455_s1 + $0x450] sm:$0xff]  }
  0x56   :  { %2465 = vmatprep.subr.bf16.mxu1 %v2702_v33  ;;  %v2762_v33 = vld [vmem:[%s3455_s1 + $0x4d0] sm:$0xff]  }
  0x58   :  { %2444 = vmatpush3.bf16.msra.mxu0 %v2703_v34  ;;  %v2763_v34 = vld [vmem:[%s3455_s1 + $0x410] sm:$0xff]  }
  0x59   :  { %2466 = vmatpush3.bf16.msra.mxu1 %v2704_v35  ;;  %2445 = vmatprep.subr.bf16.mxu0 %v2705_v36  ;;  %v2764_v35 = vld [vmem:[%s3455_s1 + $0x490] sm:$0xff]   ;;  %v2765_v36 = vld [vmem:[%s3455_s1 + $0x458] sm:$0xff]  }
  0x5a   :  { %2467 = vmatprep.subr.bf16.mxu1 %v2706_v37  ;;  %v2766_v37 = vld [vmem:[%s3455_s1 + $0x4d8] sm:$0xff]  }
  0x5c   :  { %2446 = vmatpush3.bf16.msra.mxu0 %v2707_v38  ;;  %v2767_v38 = vld [vmem:[%s3455_s1 + $0x418] sm:$0xff]  }
  0x5d   :  { %2468 = vmatpush3.bf16.msra.mxu1 %v2708_v39  ;;  %2447 = vmatprep.subr.bf16.mxu0 %v2709_v40  ;;  %v2768_v39 = vld [vmem:[%s3455_s1 + $0x498] sm:$0xff]   ;;  %v2769_v40 = vld [vmem:[%s3455_s1 + $0x460] sm:$0xff]  }
  0x5e   :  { %2469 = vmatprep.subr.bf16.mxu1 %v2710_v41  ;;  %v2770_v41 = vld [vmem:[%s3455_s1 + $0x4e0] sm:$0xff]  }
  0x60   :  { %2448 = vmatpush3.bf16.msra.mxu0 %v2711_v42  ;;  %v2771_v42 = vld [vmem:[%s3455_s1 + $0x420] sm:$0xff]  }
  0x61   :  { %2470 = vmatpush3.bf16.msra.mxu1 %v2712_v43  ;;  %2477 = vmatprep.subr.bf16.mxu0 %v2717_v50  ;;  %v2772_v43 = vld [vmem:[%s3455_s1 + $0x4a0] sm:$0xff]   ;;  %v2779_v50 = vld [vmem:[%s3455_s1 + $0x430] sm:$0xff]  }
  0x62   :  { %2499 = vmatprep.subr.bf16.mxu1 %v2718_v51  ;;  %v2780_v51 = vld [vmem:[%s3455_s1 + $0x4b0] sm:$0xff]  }
  0x63   :  { %1837 = vmatmul.mubr.bf16.vlgmr.msra.gmra.mrb[8].mxu0 %v2137_v46  ;;  %v2775_v46 = vld [vmem:[%s3455_s1 + $0x428] sm:$0xff]  }
  0x64   :  { %1877 = vmatmul.mubr.bf16.vlgmr.msra.gmra.mrb[8].mxu1 %v2139_v48  ;;  %2478 = vmatpush3.bf16.msra.mxu0 %v2719_v52  ;;  %v2777_v48 = vld [vmem:[%s3455_s1 + $0x470] sm:$0xff]   ;;  %v2781_v52 = vld [vmem:[%s3455_s1 + $0x478] sm:$0xff]  }
  0x65   :  { %2500 = vmatpush3.bf16.msra.mxu1 %v2720_v53  ;;  %2479 = vmatprep.subr.bf16.mxu0 %v2721_v54  ;;  %v2782_v53 = vld [vmem:[%s3455_s1 + $0x4f8] sm:$0xff]  }
  0x66   :  { %2501 = vmatprep.subr.bf16.mxu1 %v2722_v55  ;;  %1916 = vmatprep.mubr.bf16.mxu0 %v2142_v21  ;;  %v2783_v54 = vld [vmem:[%s3455_s1 + $0x438] sm:$0xff]   ;;  %v2812_v21 = vld [vmem:[%s3455_s1 + $0x5a8] sm:$0xff]  }
  0x67   :  { %1956 = vmatprep.mubr.bf16.mxu1 %v2144_v24  ;;  %v2784_v55 = vld [vmem:[%s3455_s1 + $0x4b8] sm:$0xff]   ;;  %v2815_v24 = vld [vmem:[%s3455_s1 + $0x530] sm:$0xff]  }
  0x68   :  { %2480 = vmatpush3.bf16.msra.mxu0 %v2723_v56  ;;  %v20_v56 = vld [vmem:[%s3456_s0 + $0x40] sm:$0xff] }
  0x69   :  { %2502 = vmatpush3.bf16.msra.mxu1 %v2724_v57  ;;  %2481 = vmatprep.subr.bf16.mxu0 %v2725_v58  ;;  %v2145_v57 = vcombine.low %v20_v56, %v20_v56  ;;  %v2146_v58 = vcombine.high %v20_v56, %v20_v56 }
  0x6a   :  { %2503 = vmatprep.subr.bf16.mxu1 %v2726_v59  ;;  %v21_v59 = vld [vmem:[%s3456_s0 + $0x48] sm:$0xff] }
  0x6c   :  { %2482 = vmatpush3.bf16.msra.mxu0 %v2727_v60  ;;  %v2147_v60 = vcombine.low %v21_v59, %v21_v59 }
  0x6d   :  { %2504 = vmatpush3.bf16.msra.mxu1 %v2728_v61  ;;  %2483 = vmatprep.subr.bf16.mxu0 %v2729_v62  ;;  %v2148_v61 = vcombine.high %v21_v59, %v21_v59  ;;  %v2789_v62 = vld [vmem:[%s3455_s1 + $0x540] sm:$0xff]  }
  0x6e   :  { %2505 = vmatprep.subr.bf16.mxu1 %v2730_v63  ;;  %v2790_v63 = vld [vmem:[%s3455_s1 + $0x5c0] sm:$0xff]  }
  0x70   :  { %2484 = vmatpush3.bf16.msra.mxu0 %v2731_v0  ;;  %v2791_v0 = vld [vmem:[%s3455_s1 + $0x500] sm:$0xff]  }
  0x71   :  { %2506 = vmatpush3.bf16.msra.mxu1 %v2732_v1  ;;  %2485 = vmatprep.subr.bf16.mxu0 %v2733_v2  ;;  %v2792_v1 = vld [vmem:[%s3455_s1 + $0x580] sm:$0xff]   ;;  %v2793_v2 = vld [vmem:[%s3455_s1 + $0x548] sm:$0xff]  }
  0x72   :  { %2507 = vmatprep.subr.bf16.mxu1 %v2734_v3  ;;  %v2794_v3 = vld [vmem:[%s3455_s1 + $0x5c8] sm:$0xff]  }
  0x74   :  { %2486 = vmatpush3.bf16.msra.mxu0 %v2735_v4  ;;  %v2795_v4 = vld [vmem:[%s3455_s1 + $0x508] sm:$0xff]  }
  0x75   :  { %2508 = vmatpush3.bf16.msra.mxu1 %v2736_v5  ;;  %2487 = vmatprep.subr.bf16.mxu0 %v2737_v6  ;;  %v2796_v5 = vld [vmem:[%s3455_s1 + $0x588] sm:$0xff]   ;;  %v2797_v6 = vld [vmem:[%s3455_s1 + $0x550] sm:$0xff]  }
  0x76   :  { %2509 = vmatprep.subr.bf16.mxu1 %v2738_v7  ;;  %v2798_v7 = vld [vmem:[%s3455_s1 + $0x5d0] sm:$0xff]  }
  0x78   :  { %2488 = vmatpush3.bf16.msra.mxu0 %v2739_v8  ;;  %v2799_v8 = vld [vmem:[%s3455_s1 + $0x510] sm:$0xff]  }
  0x79   :  { %2510 = vmatpush3.bf16.msra.mxu1 %v2740_v9  ;;  %2489 = vmatprep.subr.bf16.mxu0 %v2741_v10  ;;  %v2800_v9 = vld [vmem:[%s3455_s1 + $0x590] sm:$0xff]   ;;  %v2801_v10 = vld [vmem:[%s3455_s1 + $0x558] sm:$0xff]  }
  0x7a   :  { %2511 = vmatprep.subr.bf16.mxu1 %v2742_v11  ;;  %v2802_v11 = vld [vmem:[%s3455_s1 + $0x5d8] sm:$0xff]  }
  0x7c   :  { %2490 = vmatpush3.bf16.msra.mxu0 %v2743_v12  ;;  %v2803_v12 = vld [vmem:[%s3455_s1 + $0x518] sm:$0xff]  }
  0x7d   :  { %2512 = vmatpush3.bf16.msra.mxu1 %v2744_v13  ;;  %2491 = vmatprep.subr.bf16.mxu0 %v2745_v14  ;;  %v2804_v13 = vld [vmem:[%s3455_s1 + $0x598] sm:$0xff]   ;;  %v2805_v14 = vld [vmem:[%s3455_s1 + $0x560] sm:$0xff]  }
  0x7e   :  { %2513 = vmatprep.subr.bf16.mxu1 %v2746_v15  ;;  %v2806_v15 = vld [vmem:[%s3455_s1 + $0x5e0] sm:$0xff]  }
  0x80   :  { %2492 = vmatpush3.bf16.msra.mxu0 %v2747_v16  ;;  %v2807_v16 = vld [vmem:[%s3455_s1 + $0x520] sm:$0xff]  }
  0x81   :  { %2514 = vmatpush3.bf16.msra.mxu1 %v2748_v17  ;;  %2521 = vmatprep.subr.bf16.mxu0 %v2753_v23  ;;  %v2808_v17 = vld [vmem:[%s3455_s1 + $0x5a0] sm:$0xff]   ;;  %v2814_v23 = vld [vmem:[%s3455_s1 + $0x5f0] sm:$0xff]  }
  0x82   :  { %2543 = vmatprep.subr.bf16.mxu1 %v2754_v25  ;;  %v2816_v25 = vld [vmem:[%s3455_s1 + $0x5b0] sm:$0xff]  }
  0x83   :  { %1917 = vmatmul.mubr.bf16.vlgmr.msra.gmra.mrb[12].mxu0 %v2141_v20  ;;  %v2811_v20 = vld [vmem:[%s3455_s1 + $0x528] sm:$0xff]  }
  0x84   :  { %1957 = vmatmul.mubr.bf16.vlgmr.msra.gmra.mrb[12].mxu1 %v2143_v22  ;;  %2522 = vmatpush3.bf16.msra.mxu0 %v2755_v26  ;;  %v2813_v22 = vld [vmem:[%s3455_s1 + $0x570] sm:$0xff]   ;;  %v2817_v26 = vld [vmem:[%s3455_s1 + $0x578] sm:$0xff]  }
  0x85   :  { %2544 = vmatpush3.bf16.msra.mxu1 %v2756_v27  ;;  %2523 = vmatprep.subr.bf16.mxu0 %v2757_v28  ;;  %v2818_v27 = vld [vmem:[%s3455_s1 + $0x5f8] sm:$0xff]  }
  0x86   :  { %2545 = vmatprep.subr.bf16.mxu1 %v2758_v29  ;;  %1996 = vmatprep.mubr.bf16.mxu0 %v2146_v58  ;;  %v2819_v28 = vld [vmem:[%s3455_s1 + $0x538] sm:$0xff]  }
  0x87   :  { %2036 = vmatprep.mubr.bf16.mxu1 %v2148_v61  ;;  %v2820_v29 = vld [vmem:[%s3455_s1 + $0x5b8] sm:$0xff]  }
  0x88   :  { %2524 = vmatpush3.bf16.msra.mxu0 %v2759_v30  ;;  %v22_v30 = vld [vmem:[%s3456_s0 + $0x50] sm:$0xff] }
  0x89   :  { %2546 = vmatpush3.bf16.msra.mxu1 %v2760_v31  ;;  %2525 = vmatprep.subr.bf16.mxu0 %v2761_v32  ;;  %v23_v31 = vld [vmem:[%s3456_s0 + $0x58] sm:$0xff]  ;;  %v2149_v32 = vcombine.low %v22_v30, %v22_v30 }
  0x8a   :  { %2547 = vmatprep.subr.bf16.mxu1 %v2762_v33  ;;  %v2150_v33 = vcombine.high %v22_v30, %v22_v30 }
  0x8c   :  { %2526 = vmatpush3.bf16.msra.mxu0 %v2763_v34  ;;  %v2151_v34 = vcombine.low %v23_v31, %v23_v31 }
  0x8d   :  { %2548 = vmatpush3.bf16.msra.mxu1 %v2764_v35  ;;  %2527 = vmatprep.subr.bf16.mxu0 %v2765_v36  ;;  %v2152_v35 = vcombine.high %v23_v31, %v23_v31 }
  0x8e   :  { %2549 = vmatprep.subr.bf16.mxu1 %v2766_v37 }
  0x90   :  { %2528 = vmatpush3.bf16.msra.mxu0 %v2767_v38 }
  0x91   :  { %2550 = vmatpush3.bf16.msra.mxu1 %v2768_v39  ;;  %2529 = vmatprep.subr.bf16.mxu0 %v2769_v40 }
  0x92   :  { %2551 = vmatprep.subr.bf16.mxu1 %v2770_v41 }
  0x94   :  { %2530 = vmatpush3.bf16.msra.mxu0 %v2771_v42 }
  0x95   :  { %2552 = vmatpush3.bf16.msra.mxu1 %v2772_v43  ;;  %2531 = vmatprep.subr.bf16.mxu0 %v2773_v44 }
  0x96   :  { %2553 = vmatprep.subr.bf16.mxu1 %v2774_v45 }
  0x98   :  { %2532 = vmatpush3.bf16.msra.mxu0 %v2775_v46 }
  0x99   :  { %2554 = vmatpush3.bf16.msra.mxu1 %v2776_v47  ;;  %2533 = vmatprep.subr.bf16.mxu0 %v2777_v48 }
  0x9a   :  { %2555 = vmatprep.subr.bf16.mxu1 %v2778_v49 }
  0x9c   :  { %2534 = vmatpush3.bf16.msra.mxu0 %v2779_v50 }
  0x9d   :  { %2556 = vmatpush3.bf16.msra.mxu1 %v2780_v51  ;;  %2535 = vmatprep.subr.bf16.mxu0 %v2781_v52 }
  0x9e   :  { %2557 = vmatprep.subr.bf16.mxu1 %v2782_v53 }
  0xa0   :  { %2536 = vmatpush3.bf16.msra.mxu0 %v2783_v54 }
  0xa1   :  { %2558 = vmatpush3.bf16.msra.mxu1 %v2784_v55  ;;  %2565 = vmatprep.subr.bf16.mxu0 %v2789_v62 }
  0xa2   :  { %2587 = vmatprep.subr.bf16.mxu1 %v2790_v63 }
  0xa3   :  { %1997 = vmatmul.mubr.bf16.vlgmr.msra.gmra.mrb[16].mxu0 %v2145_v57 }
  0xa4   :  { %2037 = vmatmul.mubr.bf16.vlgmr.msra.gmra.mrb[16].mxu1 %v2147_v60  ;;  %2566 = vmatpush3.bf16.msra.mxu0 %v2791_v0 }
  0xa5   :  { %2588 = vmatpush3.bf16.msra.mxu1 %v2792_v1  ;;  %2567 = vmatprep.subr.bf16.mxu0 %v2793_v2 }
  0xa6   :  { %2589 = vmatprep.subr.bf16.mxu1 %v2794_v3  ;;  %2076 = vmatprep.mubr.bf16.mxu0 %v2150_v33 }
  0xa7   :  { %2116 = vmatprep.mubr.bf16.mxu1 %v2152_v35 }
  0xa8   :  { %2568 = vmatpush3.bf16.msra.mxu0 %v2795_v4 }
  0xa9   :  { %2590 = vmatpush3.bf16.msra.mxu1 %v2796_v5  ;;  %2569 = vmatprep.subr.bf16.mxu0 %v2797_v6 }
  0xaa   :  { %2591 = vmatprep.subr.bf16.mxu1 %v2798_v7 }
  0xac   :  { %2570 = vmatpush3.bf16.msra.mxu0 %v2799_v8 }
  0xad   :  { %2592 = vmatpush3.bf16.msra.mxu1 %v2800_v9  ;;  %2571 = vmatprep.subr.bf16.mxu0 %v2801_v10 }
  0xae   :  { %2593 = vmatprep.subr.bf16.mxu1 %v2802_v11 }
  0xb0   :  { %2572 = vmatpush3.bf16.msra.mxu0 %v2803_v12 }
  0xb1   :  { %2594 = vmatpush3.bf16.msra.mxu1 %v2804_v13  ;;  %2573 = vmatprep.subr.bf16.mxu0 %v2805_v14 }
  0xb2   :  { %2595 = vmatprep.subr.bf16.mxu1 %v2806_v15 }
  0xb4   :  { %2574 = vmatpush3.bf16.msra.mxu0 %v2807_v16 }
  0xb5   :  { %2596 = vmatpush3.bf16.msra.mxu1 %v2808_v17  ;;  %2575 = vmatprep.subr.bf16.mxu0 %v2809_v18 }
  0xb6   :  { %2597 = vmatprep.subr.bf16.mxu1 %v2810_v19 }
  0xb8   :  { %2576 = vmatpush3.bf16.msra.mxu0 %v2811_v20 }
  0xb9   :  { %2598 = vmatpush3.bf16.msra.mxu1 %v2812_v21  ;;  %2577 = vmatprep.subr.bf16.mxu0 %v2813_v22 }
  0xba   :  { %2599 = vmatprep.subr.bf16.mxu1 %v2814_v23 }
  0xbc   :  { %2578 = vmatpush3.bf16.msra.mxu0 %v2815_v24 }
  0xbd   :  { %2600 = vmatpush3.bf16.msra.mxu1 %v2816_v25  ;;  %2579 = vmatprep.subr.bf16.mxu0 %v2817_v26 }
  0xbe   :  { %2601 = vmatprep.subr.bf16.mxu1 %v2818_v27 }
  0xc0   :  { %2580 = vmatpush3.bf16.msra.mxu0 %v2819_v28 }
  0xc1   :  { %2602 = vmatpush3.bf16.msra.mxu1 %v2820_v29 }
  0xc3   :  { %2077 = vmatmul.mubr.bf16.vlgmr.msra.gmra.mrb[20].mxu0 %v2149_v32 }
  0xc4   :  { %2117 = vmatmul.mubr.bf16.vlgmr.msra.gmra.mrb[20].mxu1 %v2151_v34 }
  0xf6   :  { %v2361_v36 = vpop.f32.mrb[0].mxu0 }
  0xf7   :  { %v2383_v37 = vpop.f32.mrb[0].mxu1  ;;  %v2362_v38 = vpop.f32.mrb[1].mxu0 }
  0xf8   :  { %v2384_v39 = vpop.f32.mrb[1].mxu1  ;;  %v2363_v40 = vadd.f32 %v2362_v38, %v2361_v36  ;;  %v2364_v42 = vpop.f32.mrb[2].mxu0 }
  0xf9   :  { %v2385_v41 = vadd.f32 %v2384_v39, %v2383_v37  ;;  %v2386_v43 = vpop.f32.mrb[2].mxu1  ;;  %v2365_v44 = vpop.f32.mrb[3].mxu0 }
  0xfa   :  { %v2387_v45 = vpop.f32.mrb[3].mxu1 }
  0xfb   :  { %v1719_v46 = vadd.f32 %v2385_v41, %v2363_v40 }
 0x116   :  { %v2405_v47 = vpop.f32.mrb[4].mxu0 }
 0x117   :  { %v2427_v48 = vpop.f32.mrb[4].mxu1  ;;  %v2406_v49 = vpop.f32.mrb[5].mxu0 }
 0x118   :  { %v2428_v50 = vpop.f32.mrb[5].mxu1  ;;  %v2407_v51 = vadd.f32 %v2406_v49, %v2405_v47  ;;  %v2408_v53 = vpop.f32.mrb[6].mxu0 }
 0x119   :  { %v2429_v52 = vadd.f32 %v2428_v50, %v2427_v48  ;;  %v2430_v54 = vpop.f32.mrb[6].mxu1  ;;  %v2409_v55 = vpop.f32.mrb[7].mxu0 }
 0x11a   :  { %v2431_v56 = vpop.f32.mrb[7].mxu1  ;;  %v1759_v57 = vadd.f32 %v2407_v51, %v1719_v46 }
 0x11c   :  { %v1799_v58 = vadd.f32 %v2429_v52, %v1759_v57 }
 0x136   :  { %v2449_v59 = vpop.f32.mrb[8].mxu0 }
 0x137   :  { %v2471_v60 = vpop.f32.mrb[8].mxu1  ;;  %v2450_v61 = vpop.f32.mrb[9].mxu0 }
 0x138   :  { %v2451_v62 = vadd.f32 %v2450_v61, %v2449_v59  ;;  %v2472_v63 = vpop.f32.mrb[9].mxu1  ;;  %v2452_v0 = vpop.f32.mrb[10].mxu0 }
 0x139   :  { %v2473_v1 = vadd.f32 %v2472_v63, %v2471_v60  ;;  %v2474_v2 = vpop.f32.mrb[10].mxu1  ;;  %v2453_v3 = vpop.f32.mrb[11].mxu0 }
 0x13a   :  { %v1839_v4 = vadd.f32 %v2451_v62, %v1799_v58  ;;  %v2475_v5 = vpop.f32.mrb[11].mxu1 }
 0x13c   :  { %v1879_v6 = vadd.f32 %v2473_v1, %v1839_v4 }
 0x156   :  { %v2493_v7 = vpop.f32.mrb[12].mxu0 }
 0x157   :  { %v2515_v8 = vpop.f32.mrb[12].mxu1  ;;  %v2494_v9 = vpop.f32.mrb[13].mxu0 }
 0x158   :  { %v2495_v10 = vadd.f32 %v2494_v9, %v2493_v7  ;;  %v2516_v11 = vpop.f32.mrb[13].mxu1  ;;  %v2496_v12 = vpop.f32.mrb[14].mxu0 }
 0x159   :  { %v2517_v13 = vadd.f32 %v2516_v11, %v2515_v8  ;;  %v2518_v14 = vpop.f32.mrb[14].mxu1  ;;  %v2497_v15 = vpop.f32.mrb[15].mxu0 }
 0x15a   :  { %v1919_v16 = vadd.f32 %v2495_v10, %v1879_v6  ;;  %v2519_v17 = vpop.f32.mrb[15].mxu1 }
 0x15c   :  { %v1959_v18 = vadd.f32 %v2517_v13, %v1919_v16 }
 0x176   :  { %v2537_v19 = vpop.f32.mrb[16].mxu0 }
 0x177   :  { %v2559_v20 = vpop.f32.mrb[16].mxu1  ;;  %v2538_v21 = vpop.f32.mrb[17].mxu0 }
 0x178   :  { %v2560_v22 = vpop.f32.mrb[17].mxu1  ;;  %v2539_v23 = vadd.f32 %v2538_v21, %v2537_v19  ;;  %v2540_v25 = vpop.f32.mrb[18].mxu0 }
 0x179   :  { %v2561_v24 = vadd.f32 %v2560_v22, %v2559_v20  ;;  %v2562_v26 = vpop.f32.mrb[18].mxu1  ;;  %v2541_v27 = vpop.f32.mrb[19].mxu0 }
 0x17a   :  { %v2563_v28 = vpop.f32.mrb[19].mxu1  ;;  %v1999_v29 = vadd.f32 %v2539_v23, %v1959_v18 }
 0x17c   :  { %v2039_v30 = vadd.f32 %v2561_v24, %v1999_v29 }
 0x196   :  { %v2581_v31 = vpop.f32.mrb[20].mxu0 }
 0x197   :  { %v2603_v32 = vpop.f32.mrb[20].mxu1  ;;  %v2582_v33 = vpop.f32.mrb[21].mxu0 }
 0x198   :  { %v2583_v34 = vadd.f32 %v2582_v33, %v2581_v31  ;;  %v2604_v35 = vpop.f32.mrb[21].mxu1  ;;  %v2584_v36 = vpop.f32.mrb[22].mxu0 }
 0x199   :  { %v2605_v37 = vadd.f32 %v2604_v35, %v2603_v32  ;;  %v2606_v38 = vpop.f32.mrb[22].mxu1  ;;  %v2585_v39 = vpop.f32.mrb[23].mxu0 }
 0x19a   :  { %v2079_v40 = vadd.f32 %v2583_v34, %v2039_v30  ;;  %v2607_v41 = vpop.f32.mrb[23].mxu1 }
 0x19c   :  { %v2119_v42 = vadd.f32 %v2605_v37, %v2079_v40 }
 0x19e   :  { %2124 = vst [vmem:[%s3457_s2] sm:$0xff] %v2119_v42 }

// kernel: _lambda_.5
= control target key start
LH: loop header
LB: loop body
LE: loop exit
PB: predicated region body
PF: predicated region fallthrough
CT: control target
= control target key end

     0   :  { %vm31_vm0 = vcmask 1041408   ;;  %s694_s0 = inlined_call_operand.vmem [shape: f32[2,128], index: 0, kind: input, shape index: {}]   ;;  %s695_s1 = inlined_call_operand.vmem [shape: f32[1,128], index: 1, kind: input, shape index: {}]   ;;  %s696_s2 = inlined_call_operand.vmem [shape: f32[1,128], index: 2, kind: input, shape index: {}]   ;;  %s697_s3 = inlined_call_operand.vmem [shape: bf16[128,256], index: 3, kind: input, shape index: {}]   ;;  %s698_s4 = inlined_call_operand.vmem [shape: f32[1,256], index: 4, kind: input, shape index: {}]   ;;  %s699_s5 = inlined_call_operand.vmem [shape: bf16[256,128], index: 5, kind: input, shape index: {}]   ;;  %s700_s6 = inlined_call_operand.vmem [shape: f32[1,128], index: 6, kind: input, shape index: {}]   ;;  %s701_s7 = inlined_call_operand.hbm [shape: f32[2,128], index: 7, kind: output, shape index: {}]  }
   0x1   :  { %v28_v0 = vld [vmem:[%s694_s0] sm:$0x3] }
   0x2   :  { %v32_v1 = vsel %vm31_vm0, %v28_v0, 0.0 }
   0x3   :  { %33 = vadd.xlane.f32.xlu0 %v32_v1 }
   0x4   :  { %12 = vsyncpa [#allocation3], 0  ;;  %v461_v2 = vld [vmem:[%s697_s3 + $0x4] ss:$8 sps:$4 sm:$0xff]   ;;  %v463_v3 = vld [vmem:[%s697_s3] ss:$8 sps:$4 sm:$0xff]   ;;  %v79_v50 = vlaneseq }
   0x5   :  { %v464_v4 = vld [vmem:[%s697_s3 + $0x14] ss:$8 sps:$4 sm:$0xff]   ;;  %169 = vmatprep.subr.bf16.mxu0 %v461_v2  ;;  %v466_v5 = vld [vmem:[%s697_s3 + $0x10] ss:$8 sps:$4 sm:$0xff]   ;;  %v467_v6 = vld [vmem:[%s697_s3 + $0x24] ss:$8 sps:$4 sm:$0xff]  }
   0x6   :  { %170 = vmatpush1.bf16.msra.mxu0 %v463_v3  ;;  %v469_v12 = vld [vmem:[%s697_s3 + $0x20] ss:$8 sps:$4 sm:$0xff]   ;;  %v470_v13 = vld [vmem:[%s697_s3 + $0x34] ss:$8 sps:$4 sm:$0xff]   ;;  %v472_v14 = vld [vmem:[%s697_s3 + $0x30] ss:$8 sps:$4 sm:$0xff]  }
   0x7   :  { %171 = vmatprep.subr.bf16.mxu0 %v464_v4  ;;  %v473_v15 = vld [vmem:[%s697_s3 + $0x44] ss:$8 sps:$4 sm:$0xff]   ;;  %v475_v16 = vld [vmem:[%s697_s3 + $0x40] ss:$8 sps:$4 sm:$0xff]   ;;  %v476_v17 = vld [vmem:[%s697_s3 + $0x54] ss:$8 sps:$4 sm:$0xff]  }
   0x8   :  { %v527_v18 = vmov 0   ;;  %v478_v19 = vld [vmem:[%s697_s3 + $0x50] ss:$8 sps:$4 sm:$0xff]   ;;  %v479_v20 = vld [vmem:[%s697_s3 + $0x64] ss:$8 sps:$4 sm:$0xff]   ;;  %v80_v51 = vshrl.u32 %v79_v50, 7 }
   0x9   :  { %201 = vmatprep.mubr.bf16.mxu0 %v527_v18  ;;  %v481_v21 = vld [vmem:[%s697_s3 + $0x60] ss:$8 sps:$4 sm:$0xff]   ;;  %v482_v22 = vld [vmem:[%s697_s3 + $0x74] ss:$8 sps:$4 sm:$0xff]   ;;  %v484_v23 = vld [vmem:[%s697_s3 + $0x70] ss:$8 sps:$4 sm:$0xff]  }
   0xa   :  { %172 = vmatpush1.bf16.msra.mxu0 %v466_v5  ;;  %v485_v24 = vld [vmem:[%s699_s5 + $0x40] sm:$0xff]   ;;  %v487_v26 = vld [vmem:[%s699_s5 + $0x48] sm:$0xff]   ;;  %v489_v28 = vld [vmem:[%s699_s5 + $0x50] sm:$0xff]   ;;  %v81_v52 = vsub.s32 0, %v80_v51  ;;  %v85_v54 = vsub.s32 1, %v80_v51 }
   0xb   :  { %173 = vmatprep.subr.bf16.mxu0 %v467_v6  ;;  %v486_v25 = vld [vmem:[%s699_s5] sm:$0xff]   ;;  %437 = vmatprep.subr.bf16.mxu1 %v485_v24  ;;  %v488_v27 = vld [vmem:[%s699_s5 + $0x8] sm:$0xff]   ;;  %v490_v29 = vld [vmem:[%s699_s5 + $0x10] sm:$0xff]  }
   0xc   :  { %438 = vmatpush3.bf16.msra.mxu1 %v486_v25  ;;  %v491_v30 = vld [vmem:[%s699_s5 + $0x58] sm:$0xff]   ;;  %v493_v32 = vld [vmem:[%s699_s5 + $0x60] sm:$0xff]   ;;  %v495_v34 = vld [vmem:[%s699_s5 + $0x68] sm:$0xff]  }
   0xd   :  { %439 = vmatprep.subr.bf16.mxu1 %v487_v26  ;;  %v492_v31 = vld [vmem:[%s699_s5 + $0x18] sm:$0xff]   ;;  %v494_v33 = vld [vmem:[%s699_s5 + $0x20] sm:$0xff]   ;;  %v496_v35 = vld [vmem:[%s699_s5 + $0x28] sm:$0xff]  }
   0xe   :  { %174 = vmatpush1.bf16.msra.mxu0 %v469_v12  ;;  %v497_v36 = vld [vmem:[%s699_s5 + $0x70] sm:$0xff]   ;;  %v402_v41 = vld [vmem:[%s695_s1] ss:$0 sm:$0xff]  ;;  %v499_v48 = vld [vmem:[%s699_s5 + $0x78] sm:$0xff]  }
   0xf   :  { %175 = vmatprep.subr.bf16.mxu0 %v470_v13  ;;  %v403_v43 = vld [vmem:[%s696_s2] ss:$0 sm:$0xff]  ;;  %v498_v47 = vld [vmem:[%s699_s5 + $0x30] sm:$0xff]   ;;  %v500_v49 = vld [vmem:[%s699_s5 + $0x38] sm:$0xff]  }
  0x10   :  { %440 = vmatpush3.bf16.msra.mxu1 %v488_v27  ;;  %v77_v53 = vld [vmem:[%s698_s4] sm:$0x3]  ;;  %s528_s4 = smov [#allocation2]  }
  0x11   :  { %441 = vmatprep.subr.bf16.mxu1 %v489_v28  ;;  %v82_v55 = vrot.slane %v77_v53, %v81_v52  ;;  %v86_v56 = vrot.slane %v77_v53, %v85_v54  ;;  %v420_v3 = vld [vmem:[%s700_s6] ss:$0 sm:$0xff]  ;;  %s394_s21 = sshll.u32 %s528_s4, 4  ;;  %s395_s21 = int_to_ptr.vmem [resolvable:$true] %s394_s21 }
  0x12   :  { %176 = vmatpush1.bf16.msra.mxu0 %v472_v14  ;;  %s503_s22 = scalar_lea.vmem %s395_s21, 32  ;;  %p508_p1 = scmp.lt.s32.totalorder %s395_s21, %s395_s21 }
  0x13   :  { %177 = vmatprep.subr.bf16.mxu0 %v473_v15  ;;  %p504_p0 = scmp.ne.s32.totalorder %s395_s21, %s503_s22  ;;  %p509_p2 = scmp.lt.s32.totalorder %s503_s22, %s503_s22 }
  0x14   :  { %442 = vmatpush3.bf16.msra.mxu1 %v490_v29 }
  0x15   :  { %443 = vmatprep.subr.bf16.mxu1 %v491_v30  ;;  %p510_p3 = por %p509_p2, %p508_p1 }
  0x16   :  { %178 = vmatpush1.bf16.msra.mxu0 %v475_v16 }
  0x17   :  { %179 = vmatprep.subr.bf16.mxu0 %v476_v17  ;;  %p511_p4 = pnand %p510_p3, %p504_p0 }
  0x18   :  { %444 = vmatpush3.bf16.msra.mxu1 %v492_v31 }
  0x19   :  { %445 = vmatprep.subr.bf16.mxu1 %v493_v32 }
  0x1a   :  { %180 = vmatpush1.bf16.msra.mxu0 %v478_v19 }
  0x1b   :  { %181 = vmatprep.subr.bf16.mxu0 %v479_v20 }
  0x1c   :  { %446 = vmatpush3.bf16.msra.mxu1 %v494_v33 }
  0x1d   :  { %447 = vmatprep.subr.bf16.mxu1 %v495_v34 }
  0x1e   :  { %182 = vmatpush1.bf16.msra.mxu0 %v481_v21 }
  0x1f   :  { %183 = vmatprep.subr.bf16.mxu0 %v482_v22 }
  0x20   :  { %448 = vmatpush3.bf16.msra.mxu1 %v496_v35 }
  0x21   :  { %449 = vmatprep.subr.bf16.mxu1 %v497_v36 }
  0x22   :  { %184 = vmatpush1.bf16.msra.mxu0 %v484_v23 }
  0x24   :  { %450 = vmatpush3.bf16.msra.mxu1 %v498_v47 }
  0x25   :  { %451 = vmatprep.subr.bf16.mxu1 %v499_v48 }
  0x28   :  { %452 = vmatpush3.bf16.msra.mxu1 %v500_v49 }
  0x90   :  { %v34_v7 = vpop.xlane.xlu0 %33 }
  0x91   :  { %v36_v8 = vmul.f32 0.0078125, %v34_v7 }
  0x93   :  { %v37_v9 = vsub.f32 %v28_v0, %v36_v8 }
  0x95   :  { %v38_v10 = vmul.f32 %v37_v9, %v37_v9 }
  0x97   :  { %v39_v11 = vsel %vm31_vm0, %v38_v10, 0.0 }
  0x98   :  { %40 = vadd.xlane.f32.xlu0 %v39_v11 }
 0x125   :  { %v41_v37 = vpop.xlane.xlu0 %40 }
 0x126   :  { %v42_v38 = vmul.f32 0.0078125, %v41_v37 }
 0x128   :  { %v43_v39 = vadd.f32 1e-05, %v42_v38 }
 0x12a   :  { %501 = vrsqrt.f32 %v43_v39 }
 0x134   :  { %v502_v40 = vpop.eup %501 }
 0x135   :  { %v45_v42 = vmul.f32 %v502_v40, %v37_v9 }
 0x137   :  { %v52_v44 = vmul.f32 %v402_v41, %v45_v42 }
 0x139   :  { %v59_v45 = vadd.f32 %v403_v43, %v52_v44 }
 0x13b   :  { %v60_v46 = vpack.c.bf16 %v59_v45, %v59_v45 }
 0x13d   :  { %202 = vmatmul.mubr.bf16.vlgmr.msra.gmra.mrb[0].mxu0 %v60_v46 }
 0x210   :  { %v203_v57 = vpop.f32.mrb[0].mxu0 }
 0x211   :  { %v204_v58 = vadd.f32 %v203_v57, %v82_v55  ;;  %v205_v59 = vpop.f32.mrb[1].mxu0 }
 0x212   :  { %v207_v60 = vpop.f32.mrb[2].mxu0  ;;  %v206_v61 = vadd.f32 %v205_v59, %v86_v56 }
 0x213   :  { %v208_v62 = vpop.f32.mrb[3].mxu0  ;;  %v210_v0 = vpack.c.bf16 %v204_v58, %v204_v58 }
 0x214   :  { %v211_v63 = vpack.c.bf16 %v206_v61, %v206_v61 }
 0x216   :  { %379 = vmatprep.mubr.bf16.mxu1 %v211_v63 }
 0x217   :  { %380 = vmatmul.mubr.bf16.vlgmr.msra.gmra.mrb[0].mxu1 %v210_v0 }
 0x2ea   :  { %v453_v1 = vpop.f32.mrb[0].mxu1 }
 0x2eb   :  { %v454_v2 = vpop.f32.mrb[1].mxu1 }
 0x2ec   :  { %v455_v4 = vadd.f32 %v454_v2, %v453_v1  ;;  %v456_v5 = vpop.f32.mrb[2].mxu1 }
 0x2ed   :  { %v457_v6 = vpop.f32.mrb[3].mxu1 }
 0x2ee   :  { %v382_v7 = vadd.f32 %v455_v4, %v420_v3 }
 0x2f0   :  { %387 = vst [vmem:[#allocation2] sm:$0x3] %v382_v7 }
 0x2f1   :  { %514 = shalt.err (!%p511_p4)
}
 0x2f2   :  { %s515_s25 = scalar_lea.hbm %s701_s7, 32 }
 0x2f3   :  { %p516_p5 = scmp.ne.s32.totalorder %s701_s7, %s515_s25  ;;  %p519_p6 = scmp.lt.u32.totalorder %s515_s25, %s701_s7 }
 0x2f5   :  { %p521_p7 = pnand %p519_p6, %p516_p5 }
 0x2f7   :  { %524 = shalt.err (!%p521_p7)
}
 0x2f8   :  { %397 = dma.vmem_to_hbm [thread:$0]  %s395_s21, 32, %s701_s7, [#allocation3]  }
 0x2f9   :  { %525 = dma.done.wait [#allocation3], 32  }
 0x2fa   :  { %526 = vsyncadd [#allocation3], 4294967264 }
 0x2fb   :  { %401 = vsyncpa [#allocation3], 1 }

</bundles_post_ra>
